<compile_context>
chip_gen: v7x
topology: tpu7x:2x2x1
jax: 0.10.0
libtpu: 0.0.40
codegen_flags: <defaults>
</compile_context>

<pallas_src>
import numpy as np
import jax
import jax.numpy as jnp
from jax.experimental import pallas as pl
from jax.experimental.pallas import tpu as pltpu


# ---------------------------------------------------------------------------
# Wrapper-side helpers: BN folding, folded (tap-major) weights, gather mats.
# ---------------------------------------------------------------------------

def _round_up(n, m):
    return (n + m - 1) // m * m


def _fold_bn(w, bn):
    """Fold inference BatchNorm2d into the conv weight / bias (conv has no bias)."""
    gamma, beta, mean, var, eps = bn
    scale = gamma / jnp.sqrt(var + eps)
    return w * scale[:, None, None, None], beta - mean * scale


def _fold_taps(w, cin_pad, cout_pad):
    """(Cout, Cin, K, K) -> (cout_pad, K*K*cin_pad) with zero channel padding.

    Column index = (dy*K + dx) * cin_pad + cin, matching the slab row layout
    written by the kernel.
    """
    cout, cin, kh, kw = w.shape
    wp = jnp.zeros((cout_pad, cin_pad, kh, kw), w.dtype)
    wp = wp.at[:cout, :cin].set(w)
    return jnp.transpose(wp, (0, 2, 3, 1)).reshape(cout_pad, kh * kw * cin_pad)


def _pad_bias(b, cout_pad):
    return jnp.zeros((cout_pad, 1), jnp.float32).at[:b.shape[0], 0].set(b)


def _gather_mats(hi, wi, k, stride, pad, ho, wo):
    """0/1 matrices G[t] of shape (Hi*Wi, Ho*Wo).

    (X @ G[t])[c, ho*Wo+wo] == Xpad[c, stride*ho + dy, stride*wo + dx] with
    t = dy*k + dx.  Taps landing in the zero padding become all-zero columns,
    so padding (including the asymmetric F.pad [0,1,0,1]) is exact.  Since
    every column has at most a single 1, the gather is exact in bf16 too.
    """
    g = np.zeros((k * k, hi * wi, ho * wo), np.float32)
    for dy in range(k):
        for dx in range(k):
            t = dy * k + dx
            for oy in range(ho):
                r = stride * oy + dy - pad
                if r < 0 or r >= hi:
                    continue
                for ox in range(wo):
                    c = stride * ox + dx - pad
                    if 0 <= c < wi:
                        g[t, r * wi + c, oy * wo + ox] = 1.0
    return jnp.asarray(g)


# ---------------------------------------------------------------------------
# Fused HGStem kernel: one image per grid step, one matmul per conv layer.
# ---------------------------------------------------------------------------

def _hgstem_kernel(x_ref, g1_ref, g2_ref, g3_ref,
                   w1_ref, b1_ref, w2a_ref, b2a_ref, w2b_ref, b2b_ref,
                   w3_ref, b3_ref, w4_ref, b4_ref,
                   o_ref,
                   slab1, slab2a, slab2b, slab3):
    f32, bf16 = jnp.float32, jnp.bfloat16
    c1p = x_ref.shape[1]            # padded input channels (multiple of 8)
    cmp_ = w1_ref.shape[0]          # padded cm
    cap = w2a_ref.shape[0]          # padded cm // 2

    x = x_ref[0]                                                   # (c1p, H*W) bf16

    # ---- stem1: 3x3 / s2 / p1 conv (BN folded) + ReLU -------------------
    for t in range(g1_ref.shape[0]):                               # 9 taps -> slab
        slab1[t * c1p:(t + 1) * c1p, :] = jnp.dot(
            x, g1_ref[t], preferred_element_type=f32)
    y1 = jnp.maximum(
        jnp.dot(w1_ref[...], slab1[...].astype(bf16), preferred_element_type=f32)
        + b1_ref[...], 0.0).astype(bf16)                           # (cmp, P1)

    # ---- stem2a patches (shared with the 2x2/s1 ceil-mode maxpool) ------
    for t in range(g2_ref.shape[0]):                               # 4 taps
        slab2a[t * cmp_:(t + 1) * cmp_, :] = jnp.dot(
            y1, g2_ref[t], preferred_element_type=f32)
    y2a = jnp.maximum(
        jnp.dot(w2a_ref[...], slab2a[...].astype(bf16), preferred_element_type=f32)
        + b2a_ref[...], 0.0).astype(bf16)                          # (cap, P1)
    # maxpool(2,1,ceil) over the right/bottom-padded y1 == max over the 4 taps
    x1 = jnp.maximum(
        jnp.maximum(slab2a[0:cmp_, :], slab2a[cmp_:2 * cmp_, :]),
        jnp.maximum(slab2a[2 * cmp_:3 * cmp_, :], slab2a[3 * cmp_:4 * cmp_, :]),
    ).astype(bf16)                                                 # (cmp, P1)

    # ---- stem2b: 2x2 conv on right/bottom-padded y2a ---------------------
    for t in range(g2_ref.shape[0]):
        slab2b[t * cap:(t + 1) * cap, :] = jnp.dot(
            y2a, g2_ref[t], preferred_element_type=f32)
    y2b = jnp.maximum(
        jnp.dot(w2b_ref[...], slab2b[...].astype(bf16), preferred_element_type=f32)
        + b2b_ref[...], 0.0).astype(bf16)                          # (cmp, P1)

    # ---- stem3: 3x3 / s2 / p1 over cat([pool, stem2b]).  Both branches go
    #      into one slab so the whole layer is a single 144-deep matmul. ----
    blk = 2 * cmp_
    for t in range(g3_ref.shape[0]):                               # 9 taps
        slab3[t * blk:t * blk + cmp_, :] = jnp.dot(
            x1, g3_ref[t], preferred_element_type=f32)
        slab3[t * blk + cmp_:(t + 1) * blk, :] = jnp.dot(
            y2b, g3_ref[t], preferred_element_type=f32)
    y3 = jnp.maximum(
        jnp.dot(w3_ref[...], slab3[...].astype(bf16), preferred_element_type=f32)
        + b3_ref[...], 0.0).astype(bf16)                           # (cmp, P2)

    # ---- stem4: 1x1 conv -------------------------------------------------
    y4 = jnp.maximum(
        jnp.dot(w4_ref[...], y3, preferred_element_type=f32) + b4_ref[...], 0.0)
    o_ref[0] = y4.astype(o_ref.dtype)


# ---------------------------------------------------------------------------
# Wrapper
# ---------------------------------------------------------------------------

def hgstem_pallas(x, params):
    N, c1, H, W = x.shape

    # Fold BN into the conv weights/biases (inference semantics).
    w1, b1 = _fold_bn(params['w1'], params['bn1'])
    w2a, b2a = _fold_bn(params['w2a'], params['bn2a'])
    w2b, b2b = _fold_bn(params['w2b'], params['bn2b'])
    w3, b3 = _fold_bn(params['w3'], params['bn3'])
    w4, b4 = _fold_bn(params['w4'], params['bn4'])
    cm, ca, c2 = w1.shape[0], w2a.shape[0], w4.shape[0]

    # Channel counts padded to multiples of 8 -> aligned slab block stores;
    # padded channels carry exact zeros and have zero weight columns.
    c1_p, cm_p, ca_p = _round_up(c1, 8), _round_up(cm, 8), _round_up(ca, 8)

    H1, W1 = (H + 2 - 3) // 2 + 1, (W + 2 - 3) // 2 + 1     # after stem1
    H2, W2 = (H1 + 2 - 3) // 2 + 1, (W1 + 2 - 3) // 2 + 1   # after stem3/stem4
    P1, P2 = H1 * W1, H2 * W2

    bf16 = jnp.bfloat16
    g1 = _gather_mats(H, W, 3, 2, 1, H1, W1).astype(bf16)     # (9, H*W, P1)
    g2 = _gather_mats(H1, W1, 2, 1, 0, H1, W1).astype(bf16)   # (4, P1,  P1)
    g3 = _gather_mats(H1, W1, 3, 2, 1, H2, W2).astype(bf16)   # (9, P1,  P2)

    w1f = _fold_taps(w1, c1_p, cm_p).astype(bf16)             # (cm_p, 9*c1_p)
    w2af = _fold_taps(w2a, cm_p, ca_p).astype(bf16)           # (ca_p, 4*cm_p)
    w2bf = _fold_taps(w2b, ca_p, cm_p).astype(bf16)           # (cm_p, 4*ca_p)
    # stem3: per-tap input layout is [pool (cm->cm_p) | stem2b (cm->cm_p)]
    w3p = jnp.zeros((cm, 2 * cm_p, 3, 3), w3.dtype)
    w3p = w3p.at[:, :cm].set(w3[:, :cm]).at[:, cm_p:cm_p + cm].set(w3[:, cm:])
    w3f = _fold_taps(w3p, 2 * cm_p, cm_p).astype(bf16)        # (cm_p, 9*2*cm_p)
    w4f = _fold_taps(w4, cm_p, c2).astype(bf16)               # (c2, cm_p)

    b1c, b2ac, b2bc = _pad_bias(b1, cm_p), _pad_bias(b2a, ca_p), _pad_bias(b2b, cm_p)
    b3c, b4c = _pad_bias(b3, cm_p), _pad_bias(b4, c2)

    # Channel-pad the input and put the flattened spatial axis on the lanes.
    x2d = jnp.zeros((N, c1_p, H * W), bf16).at[:, :c1].set(
        x.reshape(N, c1, H * W).astype(bf16))

    resident = [g1, g2, g3, w1f, b1c, w2af, b2ac, w2bf, b2bc, w3f, b3c, w4f, b4c]
    # Grid-invariant operands: whole-array VMEM residency (single-buffered).
    resident_specs = [pl.BlockSpec(memory_space=pltpu.MemorySpace.VMEM)
                      for _ in resident]

    scratch_shapes = [
        pltpu.VMEM((9 * c1_p, P1), jnp.float32),    # stem1 im2col slab
        pltpu.VMEM((4 * cm_p, P1), jnp.float32),    # stem2a slab (shared w/ pool)
        pltpu.VMEM((4 * ca_p, P1), jnp.float32),    # stem2b slab
        pltpu.VMEM((18 * cm_p, P2), jnp.float32),   # stem3 slab (both branches)
    ]

    # Explicit VMEM budget (x2 margin for layout padding), capped at v7x's 64 MiB.
    def nbytes(a):
        return int(a.size) * a.dtype.itemsize
    resident_bytes = sum(nbytes(a) for a in resident)
    io_bytes = 2 * (c1_p * H * W * 2) + 2 * (c2 * P2 * 4)   # double-buffered x / out
    scratch_bytes = 4 * (9 * c1_p * P1 + 4 * cm_p * P1 + 4 * ca_p * P1 + 18 * cm_p * P2)
    vmem_limit = int(min(64 * 2**20,
                         max(16 * 2**20,
                             2 * (resident_bytes + io_bytes + scratch_bytes))))

    out = pl.pallas_call(
        _hgstem_kernel,
        out_shape=jax.ShapeDtypeStruct((N, c2, P2), jnp.float32),
        grid_spec=pltpu.PrefetchScalarGridSpec(
            num_scalar_prefetch=0,
            grid=(N,),                                         # one image / step
            in_specs=[pl.BlockSpec((1, c1_p, H * W), lambda n: (n, 0, 0))]
                     + resident_specs,
            out_specs=pl.BlockSpec((1, c2, P2), lambda n: (n, 0, 0)),
            scratch_shapes=scratch_shapes),
        compiler_params=pltpu.CompilerParams(
            dimension_semantics=("parallel",),
            vmem_limit_bytes=vmem_limit),
    )(x2d, *resident)

    return out.reshape(N, c2, H2, W2).astype(x.dtype)


# ---------------------------------------------------------------------------
# Pure-JAX reference reproducing the PyTorch HGStem forward (inference BN).
# ---------------------------------------------------------------------------

def _conv_bn_relu(x, w, bn, stride, pad):
    y = jax.lax.conv_general_dilated(
        x, w, window_strides=(stride, stride),
        padding=[(pad, pad), (pad, pad)],
        dimension_numbers=('NCHW', 'OIHW', 'NCHW'),
        precision=jax.lax.Precision.HIGHEST)
    gamma, beta, mean, var, eps = bn
    scale = gamma / jnp.sqrt(var + eps)
    shift = beta - mean * scale
    return jnp.maximum(y * scale[None, :, None, None] + shift[None, :, None, None], 0.0)


def hgstem_reference(x, params):
    y = _conv_bn_relu(x, params['w1'], params['bn1'], 2, 1)            # stem1
    y = jnp.pad(y, ((0, 0), (0, 0), (0, 1), (0, 1)))                   # F.pad [0,1,0,1]
    y2 = _conv_bn_relu(y, params['w2a'], params['bn2a'], 1, 0)         # stem2a
    y2 = jnp.pad(y2, ((0, 0), (0, 0), (0, 1), (0, 1)))
    y2 = _conv_bn_relu(y2, params['w2b'], params['bn2b'], 1, 0)        # stem2b
    y1 = jax.lax.reduce_window(y, -jnp.inf, jax.lax.max,               # MaxPool2d(2,1)
                               (1, 1, 2, 2), (1, 1, 1, 1), 'VALID')    # (ceil==floor here)
    y = jnp.concatenate([y1, y2], axis=1)
    y = _conv_bn_relu(y, params['w3'], params['bn3'], 2, 1)            # stem3
    y = _conv_bn_relu(y, params['w4'], params['bn4'], 1, 0)            # stem4
    return y


if __name__ == "__main__":
    N, c1, H, W = 2, 3, 16, 16          # small test shapes
    cm, c2 = 8, 16

    key = jax.random.PRNGKey(0)
    keys = iter(jax.random.split(key, 32))

    def conv_w(cout, cin, k):
        std = (2.0 / (cin * k * k)) ** 0.5
        return std * jax.random.normal(next(keys), (cout, cin, k, k), jnp.float32)

    def bn(c):
        g = 1.0 + 0.1 * jax.random.normal(next(keys), (c,), jnp.float32)
        b = 0.1 * jax.random.normal(next(keys), (c,), jnp.float32)
        m = 0.05 * jax.random.normal(next(keys), (c,), jnp.float32)
        v = jnp.abs(1.0 + 0.1 * jax.random.normal(next(keys), (c,), jnp.float32))
        return (g, b, m, v, 1e-3)

    params = {
        'w1': conv_w(cm, c1, 3), 'bn1': bn(cm),
        'w2a': conv_w(cm // 2, cm, 2), 'bn2a': bn(cm // 2),
        'w2b': conv_w(cm, cm // 2, 2), 'bn2b': bn(cm),
        'w3': conv_w(cm, 2 * cm, 3), 'bn3': bn(cm),
        'w4': conv_w(c2, cm, 1), 'bn4': bn(c2),
    }

    x = jax.random.normal(next(keys), (N, c1, H, W), jnp.float32)

    out = jax.block_until_ready(hgstem_pallas(x, params))
    ref = hgstem_reference(x, params)

    assert out.shape == (N, c2, H // 4, W // 4), out.shape
    # bf16 operands / f32 accumulation: compare with bf16-level tolerances.
    max_err = float(jnp.max(jnp.abs(out - ref)))
    rel_err = float(jnp.linalg.norm(out - ref) / (jnp.linalg.norm(ref) + 1e-9))
    assert max_err < 1.5e-1 and rel_err < 2e-2, (max_err, rel_err)
    print("KERNEL_OK")
</pallas_src>

<mosaic_0001>
module attributes {stable_mosaic.version = 11 : i64} {
  func.func @_hgstem_kernel(%arg0: i32, %arg1: memref<1x8x256xbf16, #tpu.memory_space<vmem>>, %arg2: memref<9x256x64xbf16, #tpu.memory_space<vmem>>, %arg3: memref<4x64x64xbf16, #tpu.memory_space<vmem>>, %arg4: memref<9x64x16xbf16, #tpu.memory_space<vmem>>, %arg5: memref<8x72xbf16, #tpu.memory_space<vmem>>, %arg6: memref<8x1xf32, #tpu.memory_space<vmem>>, %arg7: memref<8x32xbf16, #tpu.memory_space<vmem>>, %arg8: memref<8x1xf32, #tpu.memory_space<vmem>>, %arg9: memref<8x32xbf16, #tpu.memory_space<vmem>>, %arg10: memref<8x1xf32, #tpu.memory_space<vmem>>, %arg11: memref<8x144xbf16, #tpu.memory_space<vmem>>, %arg12: memref<8x1xf32, #tpu.memory_space<vmem>>, %arg13: memref<16x8xbf16, #tpu.memory_space<vmem>>, %arg14: memref<16x1xf32, #tpu.memory_space<vmem>>, %arg15: memref<1x16x16xf32, #tpu.memory_space<vmem>>, %arg16: memref<72x64xf32, #tpu.memory_space<vmem>>, %arg17: memref<32x64xf32, #tpu.memory_space<vmem>>, %arg18: memref<32x64xf32, #tpu.memory_space<vmem>>, %arg19: memref<144x16xf32, #tpu.memory_space<vmem>>) attributes {dimension_semantics = [#tpu.dimension_semantics<parallel>], iteration_bounds = array<i64: 2>, scalar_prefetch = 0 : i64, scratch_operands = 4 : i64, tpu.core_type = #tpu.core_type<tc>, window_params = [{transform_indices = @transform_0, window_bounds = array<i64: 1, 8, 256>}, {pipeline_mode = #tpu.pipeline_mode<synchronous>, transform_indices = @transform_1, window_bounds = array<i64: 9, 256, 64>}, {pipeline_mode = #tpu.pipeline_mode<synchronous>, transform_indices = @transform_2, window_bounds = array<i64: 4, 64, 64>}, {pipeline_mode = #tpu.pipeline_mode<synchronous>, transform_indices = @transform_3, window_bounds = array<i64: 9, 64, 16>}, {pipeline_mode = #tpu.pipeline_mode<synchronous>, transform_indices = @transform_4, window_bounds = array<i64: 8, 72>}, {pipeline_mode = #tpu.pipeline_mode<synchronous>, transform_indices = @transform_5, window_bounds = array<i64: 8, 1>}, {pipeline_mode = #tpu.pipeline_mode<synchronous>, transform_indices = @transform_6, window_bounds = array<i64: 8, 32>}, {pipeline_mode = #tpu.pipeline_mode<synchronous>, transform_indices = @transform_7, window_bounds = array<i64: 8, 1>}, {pipeline_mode = #tpu.pipeline_mode<synchronous>, transform_indices = @transform_8, window_bounds = array<i64: 8, 32>}, {pipeline_mode = #tpu.pipeline_mode<synchronous>, transform_indices = @transform_9, window_bounds = array<i64: 8, 1>}, {pipeline_mode = #tpu.pipeline_mode<synchronous>, transform_indices = @transform_10, window_bounds = array<i64: 8, 144>}, {pipeline_mode = #tpu.pipeline_mode<synchronous>, transform_indices = @transform_11, window_bounds = array<i64: 8, 1>}, {pipeline_mode = #tpu.pipeline_mode<synchronous>, transform_indices = @transform_12, window_bounds = array<i64: 16, 8>}, {pipeline_mode = #tpu.pipeline_mode<synchronous>, transform_indices = @transform_13, window_bounds = array<i64: 16, 1>}, {transform_indices = @transform_14, window_bounds = array<i64: 1, 16, 16>}]} {
    %c0 = arith.constant 0 : index
    %c0_0 = arith.constant 0 : index
    %c0_1 = arith.constant 0 : index
    %0 = vector.load %arg1[%c0, %c0_0, %c0_1] : memref<1x8x256xbf16, #tpu.memory_space<vmem>>, vector<1x8x256xbf16>
    %1 = vector.shape_cast %0 : vector<1x8x256xbf16> to vector<8x256xbf16>
    %c0_2 = arith.constant 0 : index
    %c0_3 = arith.constant 0 : index
    %c0_4 = arith.constant 0 : index
    %2 = vector.load %arg2[%c0_2, %c0_3, %c0_4] : memref<9x256x64xbf16, #tpu.memory_space<vmem>>, vector<1x256x64xbf16>
    %3 = vector.shape_cast %2 : vector<1x256x64xbf16> to vector<256x64xbf16>
    %cst = arith.constant dense<0.000000e+00> : vector<8x64xf32>
    %4 = tpu.matmul %1, %3, %cst {dimension_numbers = #tpu.dot_dimension_numbers<[1], [0], [0], [1], [0, 0, 1, 1], [], []>} : vector<8x256xbf16>, vector<256x64xbf16>, vector<8x64xf32> -> vector<8x64xf32>
    %c0_5 = arith.constant 0 : index
    %c0_6 = arith.constant 0 : index
    %5 = vector.load %arg16[%c0_5, %c0_6] : memref<72x64xf32, #tpu.memory_space<vmem>>, vector<8x64xf32>
    tpu.vector_store %arg16[%c0_5, %c0_6], %4 {strides = array<i32>} : memref<72x64xf32, #tpu.memory_space<vmem>>, vector<8x64xf32>,
    %c1 = arith.constant 1 : index
    %c0_7 = arith.constant 0 : index
    %c0_8 = arith.constant 0 : index
    %6 = vector.load %arg2[%c1, %c0_7, %c0_8] : memref<9x256x64xbf16, #tpu.memory_space<vmem>>, vector<1x256x64xbf16>
    %7 = vector.shape_cast %6 : vector<1x256x64xbf16> to vector<256x64xbf16>
    %cst_9 = arith.constant dense<0.000000e+00> : vector<8x64xf32>
    %8 = tpu.matmul %1, %7, %cst_9 {dimension_numbers = #tpu.dot_dimension_numbers<[1], [0], [0], [1], [0, 0, 1, 1], [], []>} : vector<8x256xbf16>, vector<256x64xbf16>, vector<8x64xf32> -> vector<8x64xf32>
    %c8 = arith.constant 8 : index
    %c0_10 = arith.constant 0 : index
    %9 = vector.load %arg16[%c8, %c0_10] : memref<72x64xf32, #tpu.memory_space<vmem>>, vector<8x64xf32>
    tpu.vector_store %arg16[%c8, %c0_10], %8 {strides = array<i32>} : memref<72x64xf32, #tpu.memory_space<vmem>>, vector<8x64xf32>,
    %c2 = arith.constant 2 : index
    %c0_11 = arith.constant 0 : index
    %c0_12 = arith.constant 0 : index
    %10 = vector.load %arg2[%c2, %c0_11, %c0_12] : memref<9x256x64xbf16, #tpu.memory_space<vmem>>, vector<1x256x64xbf16>
    %11 = vector.shape_cast %10 : vector<1x256x64xbf16> to vector<256x64xbf16>
    %cst_13 = arith.constant dense<0.000000e+00> : vector<8x64xf32>
    %12 = tpu.matmul %1, %11, %cst_13 {dimension_numbers = #tpu.dot_dimension_numbers<[1], [0], [0], [1], [0, 0, 1, 1], [], []>} : vector<8x256xbf16>, vector<256x64xbf16>, vector<8x64xf32> -> vector<8x64xf32>
    %c16 = arith.constant 16 : index
    %c0_14 = arith.constant 0 : index
    %13 = vector.load %arg16[%c16, %c0_14] : memref<72x64xf32, #tpu.memory_space<vmem>>, vector<8x64xf32>
    tpu.vector_store %arg16[%c16, %c0_14], %12 {strides = array<i32>} : memref<72x64xf32, #tpu.memory_space<vmem>>, vector<8x64xf32>,
    %c3 = arith.constant 3 : index
    %c0_15 = arith.constant 0 : index
    %c0_16 = arith.constant 0 : index
    %14 = vector.load %arg2[%c3, %c0_15, %c0_16] : memref<9x256x64xbf16, #tpu.memory_space<vmem>>, vector<1x256x64xbf16>
    %15 = vector.shape_cast %14 : vector<1x256x64xbf16> to vector<256x64xbf16>
    %cst_17 = arith.constant dense<0.000000e+00> : vector<8x64xf32>
    %16 = tpu.matmul %1, %15, %cst_17 {dimension_numbers = #tpu.dot_dimension_numbers<[1], [0], [0], [1], [0, 0, 1, 1], [], []>} : vector<8x256xbf16>, vector<256x64xbf16>, vector<8x64xf32> -> vector<8x64xf32>
    %c24 = arith.constant 24 : index
    %c0_18 = arith.constant 0 : index
    %17 = vector.load %arg16[%c24, %c0_18] : memref<72x64xf32, #tpu.memory_space<vmem>>, vector<8x64xf32>
    tpu.vector_store %arg16[%c24, %c0_18], %16 {strides = array<i32>} : memref<72x64xf32, #tpu.memory_space<vmem>>, vector<8x64xf32>,
    %c4 = arith.constant 4 : index
    %c0_19 = arith.constant 0 : index
    %c0_20 = arith.constant 0 : index
    %18 = vector.load %arg2[%c4, %c0_19, %c0_20] : memref<9x256x64xbf16, #tpu.memory_space<vmem>>, vector<1x256x64xbf16>
    %19 = vector.shape_cast %18 : vector<1x256x64xbf16> to vector<256x64xbf16>
    %cst_21 = arith.constant dense<0.000000e+00> : vector<8x64xf32>
    %20 = tpu.matmul %1, %19, %cst_21 {dimension_numbers = #tpu.dot_dimension_numbers<[1], [0], [0], [1], [0, 0, 1, 1], [], []>} : vector<8x256xbf16>, vector<256x64xbf16>, vector<8x64xf32> -> vector<8x64xf32>
    %c32 = arith.constant 32 : index
    %c0_22 = arith.constant 0 : index
    %21 = vector.load %arg16[%c32, %c0_22] : memref<72x64xf32, #tpu.memory_space<vmem>>, vector<8x64xf32>
    tpu.vector_store %arg16[%c32, %c0_22], %20 {strides = array<i32>} : memref<72x64xf32, #tpu.memory_space<vmem>>, vector<8x64xf32>,
    %c5 = arith.constant 5 : index
    %c0_23 = arith.constant 0 : index
    %c0_24 = arith.constant 0 : index
    %22 = vector.load %arg2[%c5, %c0_23, %c0_24] : memref<9x256x64xbf16, #tpu.memory_space<vmem>>, vector<1x256x64xbf16>
    %23 = vector.shape_cast %22 : vector<1x256x64xbf16> to vector<256x64xbf16>
    %cst_25 = arith.constant dense<0.000000e+00> : vector<8x64xf32>
    %24 = tpu.matmul %1, %23, %cst_25 {dimension_numbers = #tpu.dot_dimension_numbers<[1], [0], [0], [1], [0, 0, 1, 1], [], []>} : vector<8x256xbf16>, vector<256x64xbf16>, vector<8x64xf32> -> vector<8x64xf32>
    %c40 = arith.constant 40 : index
    %c0_26 = arith.constant 0 : index
    %25 = vector.load %arg16[%c40, %c0_26] : memref<72x64xf32, #tpu.memory_space<vmem>>, vector<8x64xf32>
    tpu.vector_store %arg16[%c40, %c0_26], %24 {strides = array<i32>} : memref<72x64xf32, #tpu.memory_space<vmem>>, vector<8x64xf32>,
    %c6 = arith.constant 6 : index
    %c0_27 = arith.constant 0 : index
    %c0_28 = arith.constant 0 : index
    %26 = vector.load %arg2[%c6, %c0_27, %c0_28] : memref<9x256x64xbf16, #tpu.memory_space<vmem>>, vector<1x256x64xbf16>
    %27 = vector.shape_cast %26 : vector<1x256x64xbf16> to vector<256x64xbf16>
    %cst_29 = arith.constant dense<0.000000e+00> : vector<8x64xf32>
    %28 = tpu.matmul %1, %27, %cst_29 {dimension_numbers = #tpu.dot_dimension_numbers<[1], [0], [0], [1], [0, 0, 1, 1], [], []>} : vector<8x256xbf16>, vector<256x64xbf16>, vector<8x64xf32> -> vector<8x64xf32>
    %c48 = arith.constant 48 : index
    %c0_30 = arith.constant 0 : index
    %29 = vector.load %arg16[%c48, %c0_30] : memref<72x64xf32, #tpu.memory_space<vmem>>, vector<8x64xf32>
    tpu.vector_store %arg16[%c48, %c0_30], %28 {strides = array<i32>} : memref<72x64xf32, #tpu.memory_space<vmem>>, vector<8x64xf32>,
    %c7 = arith.constant 7 : index
    %c0_31 = arith.constant 0 : index
    %c0_32 = arith.constant 0 : index
    %30 = vector.load %arg2[%c7, %c0_31, %c0_32] : memref<9x256x64xbf16, #tpu.memory_space<vmem>>, vector<1x256x64xbf16>
    %31 = vector.shape_cast %30 : vector<1x256x64xbf16> to vector<256x64xbf16>
    %cst_33 = arith.constant dense<0.000000e+00> : vector<8x64xf32>
    %32 = tpu.matmul %1, %31, %cst_33 {dimension_numbers = #tpu.dot_dimension_numbers<[1], [0], [0], [1], [0, 0, 1, 1], [], []>} : vector<8x256xbf16>, vector<256x64xbf16>, vector<8x64xf32> -> vector<8x64xf32>
    %c56 = arith.constant 56 : index
    %c0_34 = arith.constant 0 : index
    %33 = vector.load %arg16[%c56, %c0_34] : memref<72x64xf32, #tpu.memory_space<vmem>>, vector<8x64xf32>
    tpu.vector_store %arg16[%c56, %c0_34], %32 {strides = array<i32>} : memref<72x64xf32, #tpu.memory_space<vmem>>, vector<8x64xf32>,
    %c8_35 = arith.constant 8 : index
    %c0_36 = arith.constant 0 : index
    %c0_37 = arith.constant 0 : index
    %34 = vector.load %arg2[%c8_35, %c0_36, %c0_37] : memref<9x256x64xbf16, #tpu.memory_space<vmem>>, vector<1x256x64xbf16>
    %35 = vector.shape_cast %34 : vector<1x256x64xbf16> to vector<256x64xbf16>
    %cst_38 = arith.constant dense<0.000000e+00> : vector<8x64xf32>
    %36 = tpu.matmul %1, %35, %cst_38 {dimension_numbers = #tpu.dot_dimension_numbers<[1], [0], [0], [1], [0, 0, 1, 1], [], []>} : vector<8x256xbf16>, vector<256x64xbf16>, vector<8x64xf32> -> vector<8x64xf32>
    %c64 = arith.constant 64 : index
    %c0_39 = arith.constant 0 : index
    %37 = vector.load %arg16[%c64, %c0_39] : memref<72x64xf32, #tpu.memory_space<vmem>>, vector<8x64xf32>
    tpu.vector_store %arg16[%c64, %c0_39], %36 {strides = array<i32>} : memref<72x64xf32, #tpu.memory_space<vmem>>, vector<8x64xf32>,
    %c0_40 = arith.constant 0 : index
    %c0_41 = arith.constant 0 : index
    %38 = vector.load %arg5[%c0_40, %c0_41] : memref<8x72xbf16, #tpu.memory_space<vmem>>, vector<8x72xbf16>
    %c0_42 = arith.constant 0 : index
    %c0_43 = arith.constant 0 : index
    %39 = vector.load %arg16[%c0_42, %c0_43] : memref<72x64xf32, #tpu.memory_space<vmem>>, vector<72x64xf32>
    %40 = arith.truncf %39 : vector<72x64xf32> to vector<72x64xbf16>
    %cst_44 = arith.constant dense<0.000000e+00> : vector<8x64xf32>
    %41 = tpu.matmul %38, %40, %cst_44 {dimension_numbers = #tpu.dot_dimension_numbers<[1], [0], [0], [1], [0, 0, 1, 1], [], []>} : vector<8x72xbf16>, vector<72x64xbf16>, vector<8x64xf32> -> vector<8x64xf32>
    %c0_45 = arith.constant 0 : index
    %c0_46 = arith.constant 0 : index
    %42 = vector.load %arg6[%c0_45, %c0_46] : memref<8x1xf32, #tpu.memory_space<vmem>>, vector<8x1xf32>
    %43 = vector.broadcast %42 : vector<8x1xf32> to vector<8x64xf32>
    %44 = arith.addf %41, %43 : vector<8x64xf32>
    %cst_47 = arith.constant 0.000000e+00 : f32
    %45 = vector.broadcast %cst_47 : f32 to vector<8x64xf32>
    %46 = arith.maximumf %44, %45 : vector<8x64xf32>
    %47 = arith.truncf %46 : vector<8x64xf32> to vector<8x64xbf16>
    %c0_48 = arith.constant 0 : index
    %c0_49 = arith.constant 0 : index
    %c0_50 = arith.constant 0 : index
    %48 = vector.load %arg3[%c0_48, %c0_49, %c0_50] : memref<4x64x64xbf16, #tpu.memory_space<vmem>>, vector<1x64x64xbf16>
    %49 = vector.shape_cast %48 : vector<1x64x64xbf16> to vector<64x64xbf16>
    %cst_51 = arith.constant dense<0.000000e+00> : vector<8x64xf32>
    %50 = tpu.matmul %47, %49, %cst_51 {dimension_numbers = #tpu.dot_dimension_numbers<[1], [0], [0], [1], [0, 0, 1, 1], [], []>} : vector<8x64xbf16>, vector<64x64xbf16>, vector<8x64xf32> -> vector<8x64xf32>
    %c0_52 = arith.constant 0 : index
    %c0_53 = arith.constant 0 : index
    %51 = vector.load %arg17[%c0_52, %c0_53] : memref<32x64xf32, #tpu.memory_space<vmem>>, vector<8x64xf32>
    tpu.vector_store %arg17[%c0_52, %c0_53], %50 {strides = array<i32>} : memref<32x64xf32, #tpu.memory_space<vmem>>, vector<8x64xf32>,
    %c1_54 = arith.constant 1 : index
    %c0_55 = arith.constant 0 : index
    %c0_56 = arith.constant 0 : index
    %52 = vector.load %arg3[%c1_54, %c0_55, %c0_56] : memref<4x64x64xbf16, #tpu.memory_space<vmem>>, vector<1x64x64xbf16>
    %53 = vector.shape_cast %52 : vector<1x64x64xbf16> to vector<64x64xbf16>
    %cst_57 = arith.constant dense<0.000000e+00> : vector<8x64xf32>
    %54 = tpu.matmul %47, %53, %cst_57 {dimension_numbers = #tpu.dot_dimension_numbers<[1], [0], [0], [1], [0, 0, 1, 1], [], []>} : vector<8x64xbf16>, vector<64x64xbf16>, vector<8x64xf32> -> vector<8x64xf32>
    %c8_58 = arith.constant 8 : index
    %c0_59 = arith.constant 0 : index
    %55 = vector.load %arg17[%c8_58, %c0_59] : memref<32x64xf32, #tpu.memory_space<vmem>>, vector<8x64xf32>
    tpu.vector_store %arg17[%c8_58, %c0_59], %54 {strides = array<i32>} : memref<32x64xf32, #tpu.memory_space<vmem>>, vector<8x64xf32>,
    %c2_60 = arith.constant 2 : index
    %c0_61 = arith.constant 0 : index
    %c0_62 = arith.constant 0 : index
    %56 = vector.load %arg3[%c2_60, %c0_61, %c0_62] : memref<4x64x64xbf16, #tpu.memory_space<vmem>>, vector<1x64x64xbf16>
    %57 = vector.shape_cast %56 : vector<1x64x64xbf16> to vector<64x64xbf16>
    %cst_63 = arith.constant dense<0.000000e+00> : vector<8x64xf32>
    %58 = tpu.matmul %47, %57, %cst_63 {dimension_numbers = #tpu.dot_dimension_numbers<[1], [0], [0], [1], [0, 0, 1, 1], [], []>} : vector<8x64xbf16>, vector<64x64xbf16>, vector<8x64xf32> -> vector<8x64xf32>
    %c16_64 = arith.constant 16 : index
    %c0_65 = arith.constant 0 : index
    %59 = vector.load %arg17[%c16_64, %c0_65] : memref<32x64xf32, #tpu.memory_space<vmem>>, vector<8x64xf32>
    tpu.vector_store %arg17[%c16_64, %c0_65], %58 {strides = array<i32>} : memref<32x64xf32, #tpu.memory_space<vmem>>, vector<8x64xf32>,
    %c3_66 = arith.constant 3 : index
    %c0_67 = arith.constant 0 : index
    %c0_68 = arith.constant 0 : index
    %60 = vector.load %arg3[%c3_66, %c0_67, %c0_68] : memref<4x64x64xbf16, #tpu.memory_space<vmem>>, vector<1x64x64xbf16>
    %61 = vector.shape_cast %60 : vector<1x64x64xbf16> to vector<64x64xbf16>
    %cst_69 = arith.constant dense<0.000000e+00> : vector<8x64xf32>
    %62 = tpu.matmul %47, %61, %cst_69 {dimension_numbers = #tpu.dot_dimension_numbers<[1], [0], [0], [1], [0, 0, 1, 1], [], []>} : vector<8x64xbf16>, vector<64x64xbf16>, vector<8x64xf32> -> vector<8x64xf32>
    %c24_70 = arith.constant 24 : index
    %c0_71 = arith.constant 0 : index
    %63 = vector.load %arg17[%c24_70, %c0_71] : memref<32x64xf32, #tpu.memory_space<vmem>>, vector<8x64xf32>
    tpu.vector_store %arg17[%c24_70, %c0_71], %62 {strides = array<i32>} : memref<32x64xf32, #tpu.memory_space<vmem>>, vector<8x64xf32>,
    %c0_72 = arith.constant 0 : index
    %c0_73 = arith.constant 0 : index
    %64 = vector.load %arg7[%c0_72, %c0_73] : memref<8x32xbf16, #tpu.memory_space<vmem>>, vector<8x32xbf16>
    %c0_74 = arith.constant 0 : index
    %c0_75 = arith.constant 0 : index
    %65 = vector.load %arg17[%c0_74, %c0_75] : memref<32x64xf32, #tpu.memory_space<vmem>>, vector<32x64xf32>
    %66 = arith.truncf %65 : vector<32x64xf32> to vector<32x64xbf16>
    %cst_76 = arith.constant dense<0.000000e+00> : vector<8x64xf32>
    %67 = tpu.matmul %64, %66, %cst_76 {dimension_numbers = #tpu.dot_dimension_numbers<[1], [0], [0], [1], [0, 0, 1, 1], [], []>} : vector<8x32xbf16>, vector<32x64xbf16>, vector<8x64xf32> -> vector<8x64xf32>
    %c0_77 = arith.constant 0 : index
    %c0_78 = arith.constant 0 : index
    %68 = vector.load %arg8[%c0_77, %c0_78] : memref<8x1xf32, #tpu.memory_space<vmem>>, vector<8x1xf32>
    %69 = vector.broadcast %68 : vector<8x1xf32> to vector<8x64xf32>
    %70 = arith.addf %67, %69 : vector<8x64xf32>
    %cst_79 = arith.constant 0.000000e+00 : f32
    %71 = vector.broadcast %cst_79 : f32 to vector<8x64xf32>
    %72 = arith.maximumf %70, %71 : vector<8x64xf32>
    %73 = arith.truncf %72 : vector<8x64xf32> to vector<8x64xbf16>
    %c0_80 = arith.constant 0 : index
    %c0_81 = arith.constant 0 : index
    %74 = vector.load %arg17[%c0_80, %c0_81] : memref<32x64xf32, #tpu.memory_space<vmem>>, vector<8x64xf32>
    %c8_82 = arith.constant 8 : index
    %c0_83 = arith.constant 0 : index
    %75 = vector.load %arg17[%c8_82, %c0_83] : memref<32x64xf32, #tpu.memory_space<vmem>>, vector<8x64xf32>
    %76 = arith.maximumf %74, %75 : vector<8x64xf32>
    %c16_84 = arith.constant 16 : index
    %c0_85 = arith.constant 0 : index
    %77 = vector.load %arg17[%c16_84, %c0_85] : memref<32x64xf32, #tpu.memory_space<vmem>>, vector<8x64xf32>
    %c24_86 = arith.constant 24 : index
    %c0_87 = arith.constant 0 : index
    %78 = vector.load %arg17[%c24_86, %c0_87] : memref<32x64xf32, #tpu.memory_space<vmem>>, vector<8x64xf32>
    %79 = arith.maximumf %77, %78 : vector<8x64xf32>
    %80 = arith.maximumf %76, %79 : vector<8x64xf32>
    %81 = arith.truncf %80 : vector<8x64xf32> to vector<8x64xbf16>
    %c0_88 = arith.constant 0 : index
    %c0_89 = arith.constant 0 : index
    %c0_90 = arith.constant 0 : index
    %82 = vector.load %arg3[%c0_88, %c0_89, %c0_90] : memref<4x64x64xbf16, #tpu.memory_space<vmem>>, vector<1x64x64xbf16>
    %83 = vector.shape_cast %82 : vector<1x64x64xbf16> to vector<64x64xbf16>
    %cst_91 = arith.constant dense<0.000000e+00> : vector<8x64xf32>
    %84 = tpu.matmul %73, %83, %cst_91 {dimension_numbers = #tpu.dot_dimension_numbers<[1], [0], [0], [1], [0, 0, 1, 1], [], []>} : vector<8x64xbf16>, vector<64x64xbf16>, vector<8x64xf32> -> vector<8x64xf32>
    %c0_92 = arith.constant 0 : index
    %c0_93 = arith.constant 0 : index
    %85 = vector.load %arg18[%c0_92, %c0_93] : memref<32x64xf32, #tpu.memory_space<vmem>>, vector<8x64xf32>
    tpu.vector_store %arg18[%c0_92, %c0_93], %84 {strides = array<i32>} : memref<32x64xf32, #tpu.memory_space<vmem>>, vector<8x64xf32>,
    %c1_94 = arith.constant 1 : index
    %c0_95 = arith.constant 0 : index
    %c0_96 = arith.constant 0 : index
    %86 = vector.load %arg3[%c1_94, %c0_95, %c0_96] : memref<4x64x64xbf16, #tpu.memory_space<vmem>>, vector<1x64x64xbf16>
    %87 = vector.shape_cast %86 : vector<1x64x64xbf16> to vector<64x64xbf16>
    %cst_97 = arith.constant dense<0.000000e+00> : vector<8x64xf32>
    %88 = tpu.matmul %73, %87, %cst_97 {dimension_numbers = #tpu.dot_dimension_numbers<[1], [0], [0], [1], [0, 0, 1, 1], [], []>} : vector<8x64xbf16>, vector<64x64xbf16>, vector<8x64xf32> -> vector<8x64xf32>
    %c8_98 = arith.constant 8 : index
    %c0_99 = arith.constant 0 : index
    %89 = vector.load %arg18[%c8_98, %c0_99] : memref<32x64xf32, #tpu.memory_space<vmem>>, vector<8x64xf32>
    tpu.vector_store %arg18[%c8_98, %c0_99], %88 {strides = array<i32>} : memref<32x64xf32, #tpu.memory_space<vmem>>, vector<8x64xf32>,
    %c2_100 = arith.constant 2 : index
    %c0_101 = arith.constant 0 : index
    %c0_102 = arith.constant 0 : index
    %90 = vector.load %arg3[%c2_100, %c0_101, %c0_102] : memref<4x64x64xbf16, #tpu.memory_space<vmem>>, vector<1x64x64xbf16>
    %91 = vector.shape_cast %90 : vector<1x64x64xbf16> to vector<64x64xbf16>
    %cst_103 = arith.constant dense<0.000000e+00> : vector<8x64xf32>
    %92 = tpu.matmul %73, %91, %cst_103 {dimension_numbers = #tpu.dot_dimension_numbers<[1], [0], [0], [1], [0, 0, 1, 1], [], []>} : vector<8x64xbf16>, vector<64x64xbf16>, vector<8x64xf32> -> vector<8x64xf32>
    %c16_104 = arith.constant 16 : index
    %c0_105 = arith.constant 0 : index
    %93 = vector.load %arg18[%c16_104, %c0_105] : memref<32x64xf32, #tpu.memory_space<vmem>>, vector<8x64xf32>
    tpu.vector_store %arg18[%c16_104, %c0_105], %92 {strides = array<i32>} : memref<32x64xf32, #tpu.memory_space<vmem>>, vector<8x64xf32>,
    %c3_106 = arith.constant 3 : index
    %c0_107 = arith.constant 0 : index
    %c0_108 = arith.constant 0 : index
    %94 = vector.load %arg3[%c3_106, %c0_107, %c0_108] : memref<4x64x64xbf16, #tpu.memory_space<vmem>>, vector<1x64x64xbf16>
    %95 = vector.shape_cast %94 : vector<1x64x64xbf16> to vector<64x64xbf16>
    %cst_109 = arith.constant dense<0.000000e+00> : vector<8x64xf32>
    %96 = tpu.matmul %73, %95, %cst_109 {dimension_numbers = #tpu.dot_dimension_numbers<[1], [0], [0], [1], [0, 0, 1, 1], [], []>} : vector<8x64xbf16>, vector<64x64xbf16>, vector<8x64xf32> -> vector<8x64xf32>
    %c24_110 = arith.constant 24 : index
    %c0_111 = arith.constant 0 : index
    %97 = vector.load %arg18[%c24_110, %c0_111] : memref<32x64xf32, #tpu.memory_space<vmem>>, vector<8x64xf32>
    tpu.vector_store %arg18[%c24_110, %c0_111], %96 {strides = array<i32>} : memref<32x64xf32, #tpu.memory_space<vmem>>, vector<8x64xf32>,
    %c0_112 = arith.constant 0 : index
    %c0_113 = arith.constant 0 : index
    %98 = vector.load %arg9[%c0_112, %c0_113] : memref<8x32xbf16, #tpu.memory_space<vmem>>, vector<8x32xbf16>
    %c0_114 = arith.constant 0 : index
    %c0_115 = arith.constant 0 : index
    %99 = vector.load %arg18[%c0_114, %c0_115] : memref<32x64xf32, #tpu.memory_space<vmem>>, vector<32x64xf32>
    %100 = arith.truncf %99 : vector<32x64xf32> to vector<32x64xbf16>
    %cst_116 = arith.constant dense<0.000000e+00> : vector<8x64xf32>
    %101 = tpu.matmul %98, %100, %cst_116 {dimension_numbers = #tpu.dot_dimension_numbers<[1], [0], [0], [1], [0, 0, 1, 1], [], []>} : vector<8x32xbf16>, vector<32x64xbf16>, vector<8x64xf32> -> vector<8x64xf32>
    %c0_117 = arith.constant 0 : index
    %c0_118 = arith.constant 0 : index
    %102 = vector.load %arg10[%c0_117, %c0_118] : memref<8x1xf32, #tpu.memory_space<vmem>>, vector<8x1xf32>
    %103 = vector.broadcast %102 : vector<8x1xf32> to vector<8x64xf32>
    %104 = arith.addf %101, %103 : vector<8x64xf32>
    %cst_119 = arith.constant 0.000000e+00 : f32
    %105 = vector.broadcast %cst_119 : f32 to vector<8x64xf32>
    %106 = arith.maximumf %104, %105 : vector<8x64xf32>
    %107 = arith.truncf %106 : vector<8x64xf32> to vector<8x64xbf16>
    %c0_120 = arith.constant 0 : index
    %c0_121 = arith.constant 0 : index
    %c0_122 = arith.constant 0 : index
    %108 = vector.load %arg4[%c0_120, %c0_121, %c0_122] : memref<9x64x16xbf16, #tpu.memory_space<vmem>>, vector<1x64x16xbf16>
    %109 = vector.shape_cast %108 : vector<1x64x16xbf16> to vector<64x16xbf16>
    %cst_123 = arith.constant dense<0.000000e+00> : vector<8x16xf32>
    %110 = tpu.matmul %81, %109, %cst_123 {dimension_numbers = #tpu.dot_dimension_numbers<[1], [0], [0], [1], [0, 0, 1, 1], [], []>} : vector<8x64xbf16>, vector<64x16xbf16>, vector<8x16xf32> -> vector<8x16xf32>
    %c0_124 = arith.constant 0 : index
    %c0_125 = arith.constant 0 : index
    %111 = vector.load %arg19[%c0_124, %c0_125] : memref<144x16xf32, #tpu.memory_space<vmem>>, vector<8x16xf32>
    tpu.vector_store %arg19[%c0_124, %c0_125], %110 {strides = array<i32>} : memref<144x16xf32, #tpu.memory_space<vmem>>, vector<8x16xf32>,
    %c0_126 = arith.constant 0 : index
    %c0_127 = arith.constant 0 : index
    %c0_128 = arith.constant 0 : index
    %112 = vector.load %arg4[%c0_126, %c0_127, %c0_128] : memref<9x64x16xbf16, #tpu.memory_space<vmem>>, vector<1x64x16xbf16>
    %113 = vector.shape_cast %112 : vector<1x64x16xbf16> to vector<64x16xbf16>
    %cst_129 = arith.constant dense<0.000000e+00> : vector<8x16xf32>
    %114 = tpu.matmul %107, %113, %cst_129 {dimension_numbers = #tpu.dot_dimension_numbers<[1], [0], [0], [1], [0, 0, 1, 1], [], []>} : vector<8x64xbf16>, vector<64x16xbf16>, vector<8x16xf32> -> vector<8x16xf32>
    %c8_130 = arith.constant 8 : index
    %c0_131 = arith.constant 0 : index
    %115 = vector.load %arg19[%c8_130, %c0_131] : memref<144x16xf32, #tpu.memory_space<vmem>>, vector<8x16xf32>
    tpu.vector_store %arg19[%c8_130, %c0_131], %114 {strides = array<i32>} : memref<144x16xf32, #tpu.memory_space<vmem>>, vector<8x16xf32>,
    %c1_132 = arith.constant 1 : index
    %c0_133 = arith.constant 0 : index
    %c0_134 = arith.constant 0 : index
    %116 = vector.load %arg4[%c1_132, %c0_133, %c0_134] : memref<9x64x16xbf16, #tpu.memory_space<vmem>>, vector<1x64x16xbf16>
    %117 = vector.shape_cast %116 : vector<1x64x16xbf16> to vector<64x16xbf16>
    %cst_135 = arith.constant dense<0.000000e+00> : vector<8x16xf32>
    %118 = tpu.matmul %81, %117, %cst_135 {dimension_numbers = #tpu.dot_dimension_numbers<[1], [0], [0], [1], [0, 0, 1, 1], [], []>} : vector<8x64xbf16>, vector<64x16xbf16>, vector<8x16xf32> -> vector<8x16xf32>
    %c16_136 = arith.constant 16 : index
    %c0_137 = arith.constant 0 : index
    %119 = vector.load %arg19[%c16_136, %c0_137] : memref<144x16xf32, #tpu.memory_space<vmem>>, vector<8x16xf32>
    tpu.vector_store %arg19[%c16_136, %c0_137], %118 {strides = array<i32>} : memref<144x16xf32, #tpu.memory_space<vmem>>, vector<8x16xf32>,
    %c1_138 = arith.constant 1 : index
    %c0_139 = arith.constant 0 : index
    %c0_140 = arith.constant 0 : index
    %120 = vector.load %arg4[%c1_138, %c0_139, %c0_140] : memref<9x64x16xbf16, #tpu.memory_space<vmem>>, vector<1x64x16xbf16>
    %121 = vector.shape_cast %120 : vector<1x64x16xbf16> to vector<64x16xbf16>
    %cst_141 = arith.constant dense<0.000000e+00> : vector<8x16xf32>
    %122 = tpu.matmul %107, %121, %cst_141 {dimension_numbers = #tpu.dot_dimension_numbers<[1], [0], [0], [1], [0, 0, 1, 1], [], []>} : vector<8x64xbf16>, vector<64x16xbf16>, vector<8x16xf32> -> vector<8x16xf32>
    %c24_142 = arith.constant 24 : index
    %c0_143 = arith.constant 0 : index
    %123 = vector.load %arg19[%c24_142, %c0_143] : memref<144x16xf32, #tpu.memory_space<vmem>>, vector<8x16xf32>
    tpu.vector_store %arg19[%c24_142, %c0_143], %122 {strides = array<i32>} : memref<144x16xf32, #tpu.memory_space<vmem>>, vector<8x16xf32>,
    %c2_144 = arith.constant 2 : index
    %c0_145 = arith.constant 0 : index
    %c0_146 = arith.constant 0 : index
    %124 = vector.load %arg4[%c2_144, %c0_145, %c0_146] : memref<9x64x16xbf16, #tpu.memory_space<vmem>>, vector<1x64x16xbf16>
    %125 = vector.shape_cast %124 : vector<1x64x16xbf16> to vector<64x16xbf16>
    %cst_147 = arith.constant dense<0.000000e+00> : vector<8x16xf32>
    %126 = tpu.matmul %81, %125, %cst_147 {dimension_numbers = #tpu.dot_dimension_numbers<[1], [0], [0], [1], [0, 0, 1, 1], [], []>} : vector<8x64xbf16>, vector<64x16xbf16>, vector<8x16xf32> -> vector<8x16xf32>
    %c32_148 = arith.constant 32 : index
    %c0_149 = arith.constant 0 : index
    %127 = vector.load %arg19[%c32_148, %c0_149] : memref<144x16xf32, #tpu.memory_space<vmem>>, vector<8x16xf32>
    tpu.vector_store %arg19[%c32_148, %c0_149], %126 {strides = array<i32>} : memref<144x16xf32, #tpu.memory_space<vmem>>, vector<8x16xf32>,
    %c2_150 = arith.constant 2 : index
    %c0_151 = arith.constant 0 : index
    %c0_152 = arith.constant 0 : index
    %128 = vector.load %arg4[%c2_150, %c0_151, %c0_152] : memref<9x64x16xbf16, #tpu.memory_space<vmem>>, vector<1x64x16xbf16>
    %129 = vector.shape_cast %128 : vector<1x64x16xbf16> to vector<64x16xbf16>
    %cst_153 = arith.constant dense<0.000000e+00> : vector<8x16xf32>
    %130 = tpu.matmul %107, %129, %cst_153 {dimension_numbers = #tpu.dot_dimension_numbers<[1], [0], [0], [1], [0, 0, 1, 1], [], []>} : vector<8x64xbf16>, vector<64x16xbf16>, vector<8x16xf32> -> vector<8x16xf32>
    %c40_154 = arith.constant 40 : index
    %c0_155 = arith.constant 0 : index
    %131 = vector.load %arg19[%c40_154, %c0_155] : memref<144x16xf32, #tpu.memory_space<vmem>>, vector<8x16xf32>
    tpu.vector_store %arg19[%c40_154, %c0_155], %130 {strides = array<i32>} : memref<144x16xf32, #tpu.memory_space<vmem>>, vector<8x16xf32>,
    %c3_156 = arith.constant 3 : index
    %c0_157 = arith.constant 0 : index
    %c0_158 = arith.constant 0 : index
    %132 = vector.load %arg4[%c3_156, %c0_157, %c0_158] : memref<9x64x16xbf16, #tpu.memory_space<vmem>>, vector<1x64x16xbf16>
    %133 = vector.shape_cast %132 : vector<1x64x16xbf16> to vector<64x16xbf16>
    %cst_159 = arith.constant dense<0.000000e+00> : vector<8x16xf32>
    %134 = tpu.matmul %81, %133, %cst_159 {dimension_numbers = #tpu.dot_dimension_numbers<[1], [0], [0], [1], [0, 0, 1, 1], [], []>} : vector<8x64xbf16>, vector<64x16xbf16>, vector<8x16xf32> -> vector<8x16xf32>
    %c48_160 = arith.constant 48 : index
    %c0_161 = arith.constant 0 : index
    %135 = vector.load %arg19[%c48_160, %c0_161] : memref<144x16xf32, #tpu.memory_space<vmem>>, vector<8x16xf32>
    tpu.vector_store %arg19[%c48_160, %c0_161], %134 {strides = array<i32>} : memref<144x16xf32, #tpu.memory_space<vmem>>, vector<8x16xf32>,
    %c3_162 = arith.constant 3 : index
    %c0_163 = arith.constant 0 : index
    %c0_164 = arith.constant 0 : index
    %136 = vector.load %arg4[%c3_162, %c0_163, %c0_164] : memref<9x64x16xbf16, #tpu.memory_space<vmem>>, vector<1x64x16xbf16>
    %137 = vector.shape_cast %136 : vector<1x64x16xbf16> to vector<64x16xbf16>
    %cst_165 = arith.constant dense<0.000000e+00> : vector<8x16xf32>
    %138 = tpu.matmul %107, %137, %cst_165 {dimension_numbers = #tpu.dot_dimension_numbers<[1], [0], [0], [1], [0, 0, 1, 1], [], []>} : vector<8x64xbf16>, vector<64x16xbf16>, vector<8x16xf32> -> vector<8x16xf32>
    %c56_166 = arith.constant 56 : index
    %c0_167 = arith.constant 0 : index
    %139 = vector.load %arg19[%c56_166, %c0_167] : memref<144x16xf32, #tpu.memory_space<vmem>>, vector<8x16xf32>
    tpu.vector_store %arg19[%c56_166, %c0_167], %138 {strides = array<i32>} : memref<144x16xf32, #tpu.memory_space<vmem>>, vector<8x16xf32>,
    %c4_168 = arith.constant 4 : index
    %c0_169 = arith.constant 0 : index
    %c0_170 = arith.constant 0 : index
    %140 = vector.load %arg4[%c4_168, %c0_169, %c0_170] : memref<9x64x16xbf16, #tpu.memory_space<vmem>>, vector<1x64x16xbf16>
    %141 = vector.shape_cast %140 : vector<1x64x16xbf16> to vector<64x16xbf16>
    %cst_171 = arith.constant dense<0.000000e+00> : vector<8x16xf32>
    %142 = tpu.matmul %81, %141, %cst_171 {dimension_numbers = #tpu.dot_dimension_numbers<[1], [0], [0], [1], [0, 0, 1, 1], [], []>} : vector<8x64xbf16>, vector<64x16xbf16>, vector<8x16xf32> -> vector<8x16xf32>
    %c64_172 = arith.constant 64 : index
    %c0_173 = arith.constant 0 : index
    %143 = vector.load %arg19[%c64_172, %c0_173] : memref<144x16xf32, #tpu.memory_space<vmem>>, vector<8x16xf32>
    tpu.vector_store %arg19[%c64_172, %c0_173], %142 {strides = array<i32>} : memref<144x16xf32, #tpu.memory_space<vmem>>, vector<8x16xf32>,
    %c4_174 = arith.constant 4 : index
    %c0_175 = arith.constant 0 : index
    %c0_176 = arith.constant 0 : index
    %144 = vector.load %arg4[%c4_174, %c0_175, %c0_176] : memref<9x64x16xbf16, #tpu.memory_space<vmem>>, vector<1x64x16xbf16>
    %145 = vector.shape_cast %144 : vector<1x64x16xbf16> to vector<64x16xbf16>
    %cst_177 = arith.constant dense<0.000000e+00> : vector<8x16xf32>
    %146 = tpu.matmul %107, %145, %cst_177 {dimension_numbers = #tpu.dot_dimension_numbers<[1], [0], [0], [1], [0, 0, 1, 1], [], []>} : vector<8x64xbf16>, vector<64x16xbf16>, vector<8x16xf32> -> vector<8x16xf32>
    %c72 = arith.constant 72 : index
    %c0_178 = arith.constant 0 : index
    %147 = vector.load %arg19[%c72, %c0_178] : memref<144x16xf32, #tpu.memory_space<vmem>>, vector<8x16xf32>
    tpu.vector_store %arg19[%c72, %c0_178], %146 {strides = array<i32>} : memref<144x16xf32, #tpu.memory_space<vmem>>, vector<8x16xf32>,
    %c5_179 = arith.constant 5 : index
    %c0_180 = arith.constant 0 : index
    %c0_181 = arith.constant 0 : index
    %148 = vector.load %arg4[%c5_179, %c0_180, %c0_181] : memref<9x64x16xbf16, #tpu.memory_space<vmem>>, vector<1x64x16xbf16>
    %149 = vector.shape_cast %148 : vector<1x64x16xbf16> to vector<64x16xbf16>
    %cst_182 = arith.constant dense<0.000000e+00> : vector<8x16xf32>
    %150 = tpu.matmul %81, %149, %cst_182 {dimension_numbers = #tpu.dot_dimension_numbers<[1], [0], [0], [1], [0, 0, 1, 1], [], []>} : vector<8x64xbf16>, vector<64x16xbf16>, vector<8x16xf32> -> vector<8x16xf32>
    %c80 = arith.constant 80 : index
    %c0_183 = arith.constant 0 : index
    %151 = vector.load %arg19[%c80, %c0_183] : memref<144x16xf32, #tpu.memory_space<vmem>>, vector<8x16xf32>
    tpu.vector_store %arg19[%c80, %c0_183], %150 {strides = array<i32>} : memref<144x16xf32, #tpu.memory_space<vmem>>, vector<8x16xf32>,
    %c5_184 = arith.constant 5 : index
    %c0_185 = arith.constant 0 : index
    %c0_186 = arith.constant 0 : index
    %152 = vector.load %arg4[%c5_184, %c0_185, %c0_186] : memref<9x64x16xbf16, #tpu.memory_space<vmem>>, vector<1x64x16xbf16>
    %153 = vector.shape_cast %152 : vector<1x64x16xbf16> to vector<64x16xbf16>
    %cst_187 = arith.constant dense<0.000000e+00> : vector<8x16xf32>
    %154 = tpu.matmul %107, %153, %cst_187 {dimension_numbers = #tpu.dot_dimension_numbers<[1], [0], [0], [1], [0, 0, 1, 1], [], []>} : vector<8x64xbf16>, vector<64x16xbf16>, vector<8x16xf32> -> vector<8x16xf32>
    %c88 = arith.constant 88 : index
    %c0_188 = arith.constant 0 : index
    %155 = vector.load %arg19[%c88, %c0_188] : memref<144x16xf32, #tpu.memory_space<vmem>>, vector<8x16xf32>
    tpu.vector_store %arg19[%c88, %c0_188], %154 {strides = array<i32>} : memref<144x16xf32, #tpu.memory_space<vmem>>, vector<8x16xf32>,
    %c6_189 = arith.constant 6 : index
    %c0_190 = arith.constant 0 : index
    %c0_191 = arith.constant 0 : index
    %156 = vector.load %arg4[%c6_189, %c0_190, %c0_191] : memref<9x64x16xbf16, #tpu.memory_space<vmem>>, vector<1x64x16xbf16>
    %157 = vector.shape_cast %156 : vector<1x64x16xbf16> to vector<64x16xbf16>
    %cst_192 = arith.constant dense<0.000000e+00> : vector<8x16xf32>
    %158 = tpu.matmul %81, %157, %cst_192 {dimension_numbers = #tpu.dot_dimension_numbers<[1], [0], [0], [1], [0, 0, 1, 1], [], []>} : vector<8x64xbf16>, vector<64x16xbf16>, vector<8x16xf32> -> vector<8x16xf32>
    %c96 = arith.constant 96 : index
    %c0_193 = arith.constant 0 : index
    %159 = vector.load %arg19[%c96, %c0_193] : memref<144x16xf32, #tpu.memory_space<vmem>>, vector<8x16xf32>
    tpu.vector_store %arg19[%c96, %c0_193], %158 {strides = array<i32>} : memref<144x16xf32, #tpu.memory_space<vmem>>, vector<8x16xf32>,
    %c6_194 = arith.constant 6 : index
    %c0_195 = arith.constant 0 : index
    %c0_196 = arith.constant 0 : index
    %160 = vector.load %arg4[%c6_194, %c0_195, %c0_196] : memref<9x64x16xbf16, #tpu.memory_space<vmem>>, vector<1x64x16xbf16>
    %161 = vector.shape_cast %160 : vector<1x64x16xbf16> to vector<64x16xbf16>
    %cst_197 = arith.constant dense<0.000000e+00> : vector<8x16xf32>
    %162 = tpu.matmul %107, %161, %cst_197 {dimension_numbers = #tpu.dot_dimension_numbers<[1], [0], [0], [1], [0, 0, 1, 1], [], []>} : vector<8x64xbf16>, vector<64x16xbf16>, vector<8x16xf32> -> vector<8x16xf32>
    %c104 = arith.constant 104 : index
    %c0_198 = arith.constant 0 : index
    %163 = vector.load %arg19[%c104, %c0_198] : memref<144x16xf32, #tpu.memory_space<vmem>>, vector<8x16xf32>
    tpu.vector_store %arg19[%c104, %c0_198], %162 {strides = array<i32>} : memref<144x16xf32, #tpu.memory_space<vmem>>, vector<8x16xf32>,
    %c7_199 = arith.constant 7 : index
    %c0_200 = arith.constant 0 : index
    %c0_201 = arith.constant 0 : index
    %164 = vector.load %arg4[%c7_199, %c0_200, %c0_201] : memref<9x64x16xbf16, #tpu.memory_space<vmem>>, vector<1x64x16xbf16>
    %165 = vector.shape_cast %164 : vector<1x64x16xbf16> to vector<64x16xbf16>
    %cst_202 = arith.constant dense<0.000000e+00> : vector<8x16xf32>
    %166 = tpu.matmul %81, %165, %cst_202 {dimension_numbers = #tpu.dot_dimension_numbers<[1], [0], [0], [1], [0, 0, 1, 1], [], []>} : vector<8x64xbf16>, vector<64x16xbf16>, vector<8x16xf32> -> vector<8x16xf32>
    %c112 = arith.constant 112 : index
    %c0_203 = arith.constant 0 : index
    %167 = vector.load %arg19[%c112, %c0_203] : memref<144x16xf32, #tpu.memory_space<vmem>>, vector<8x16xf32>
    tpu.vector_store %arg19[%c112, %c0_203], %166 {strides = array<i32>} : memref<144x16xf32, #tpu.memory_space<vmem>>, vector<8x16xf32>,
    %c7_204 = arith.constant 7 : index
    %c0_205 = arith.constant 0 : index
    %c0_206 = arith.constant 0 : index
    %168 = vector.load %arg4[%c7_204, %c0_205, %c0_206] : memref<9x64x16xbf16, #tpu.memory_space<vmem>>, vector<1x64x16xbf16>
    %169 = vector.shape_cast %168 : vector<1x64x16xbf16> to vector<64x16xbf16>
    %cst_207 = arith.constant dense<0.000000e+00> : vector<8x16xf32>
    %170 = tpu.matmul %107, %169, %cst_207 {dimension_numbers = #tpu.dot_dimension_numbers<[1], [0], [0], [1], [0, 0, 1, 1], [], []>} : vector<8x64xbf16>, vector<64x16xbf16>, vector<8x16xf32> -> vector<8x16xf32>
    %c120 = arith.constant 120 : index
    %c0_208 = arith.constant 0 : index
    %171 = vector.load %arg19[%c120, %c0_208] : memref<144x16xf32, #tpu.memory_space<vmem>>, vector<8x16xf32>
    tpu.vector_store %arg19[%c120, %c0_208], %170 {strides = array<i32>} : memref<144x16xf32, #tpu.memory_space<vmem>>, vector<8x16xf32>,
    %c8_209 = arith.constant 8 : index
    %c0_210 = arith.constant 0 : index
    %c0_211 = arith.constant 0 : index
    %172 = vector.load %arg4[%c8_209, %c0_210, %c0_211] : memref<9x64x16xbf16, #tpu.memory_space<vmem>>, vector<1x64x16xbf16>
    %173 = vector.shape_cast %172 : vector<1x64x16xbf16> to vector<64x16xbf16>
    %cst_212 = arith.constant dense<0.000000e+00> : vector<8x16xf32>
    %174 = tpu.matmul %81, %173, %cst_212 {dimension_numbers = #tpu.dot_dimension_numbers<[1], [0], [0], [1], [0, 0, 1, 1], [], []>} : vector<8x64xbf16>, vector<64x16xbf16>, vector<8x16xf32> -> vector<8x16xf32>
    %c128 = arith.constant 128 : index
    %c0_213 = arith.constant 0 : index
    %175 = vector.load %arg19[%c128, %c0_213] : memref<144x16xf32, #tpu.memory_space<vmem>>, vector<8x16xf32>
    tpu.vector_store %arg19[%c128, %c0_213], %174 {strides = array<i32>} : memref<144x16xf32, #tpu.memory_space<vmem>>, vector<8x16xf32>,
    %c8_214 = arith.constant 8 : index
    %c0_215 = arith.constant 0 : index
    %c0_216 = arith.constant 0 : index
    %176 = vector.load %arg4[%c8_214, %c0_215, %c0_216] : memref<9x64x16xbf16, #tpu.memory_space<vmem>>, vector<1x64x16xbf16>
    %177 = vector.shape_cast %176 : vector<1x64x16xbf16> to vector<64x16xbf16>
    %cst_217 = arith.constant dense<0.000000e+00> : vector<8x16xf32>
    %178 = tpu.matmul %107, %177, %cst_217 {dimension_numbers = #tpu.dot_dimension_numbers<[1], [0], [0], [1], [0, 0, 1, 1], [], []>} : vector<8x64xbf16>, vector<64x16xbf16>, vector<8x16xf32> -> vector<8x16xf32>
    %c136 = arith.constant 136 : index
    %c0_218 = arith.constant 0 : index
    %179 = vector.load %arg19[%c136, %c0_218] : memref<144x16xf32, #tpu.memory_space<vmem>>, vector<8x16xf32>
    tpu.vector_store %arg19[%c136, %c0_218], %178 {strides = array<i32>} : memref<144x16xf32, #tpu.memory_space<vmem>>, vector<8x16xf32>,
    %c0_219 = arith.constant 0 : index
    %c0_220 = arith.constant 0 : index
    %180 = vector.load %arg11[%c0_219, %c0_220] : memref<8x144xbf16, #tpu.memory_space<vmem>>, vector<8x144xbf16>
    %c0_221 = arith.constant 0 : index
    %c0_222 = arith.constant 0 : index
    %181 = vector.load %arg19[%c0_221, %c0_222] : memref<144x16xf32, #tpu.memory_space<vmem>>, vector<144x16xf32>
    %182 = arith.truncf %181 : vector<144x16xf32> to vector<144x16xbf16>
    %cst_223 = arith.constant dense<0.000000e+00> : vector<8x16xf32>
    %183 = tpu.matmul %180, %182, %cst_223 {dimension_numbers = #tpu.dot_dimension_numbers<[1], [0], [0], [1], [0, 0, 1, 1], [], []>} : vector<8x144xbf16>, vector<144x16xbf16>, vector<8x16xf32> -> vector<8x16xf32>
    %c0_224 = arith.constant 0 : index
    %c0_225 = arith.constant 0 : index
    %184 = vector.load %arg12[%c0_224, %c0_225] : memref<8x1xf32, #tpu.memory_space<vmem>>, vector<8x1xf32>
    %185 = vector.broadcast %184 : vector<8x1xf32> to vector<8x16xf32>
    %186 = arith.addf %183, %185 : vector<8x16xf32>
    %cst_226 = arith.constant 0.000000e+00 : f32
    %187 = vector.broadcast %cst_226 : f32 to vector<8x16xf32>
    %188 = arith.maximumf %186, %187 : vector<8x16xf32>
    %189 = arith.truncf %188 : vector<8x16xf32> to vector<8x16xbf16>
    %c0_227 = arith.constant 0 : index
    %c0_228 = arith.constant 0 : index
    %190 = vector.load %arg13[%c0_227, %c0_228] : memref<16x8xbf16, #tpu.memory_space<vmem>>, vector<16x8xbf16>
    %cst_229 = arith.constant dense<0.000000e+00> : vector<16x16xf32>
    %191 = tpu.matmul %190, %189, %cst_229 {dimension_numbers = #tpu.dot_dimension_numbers<[1], [0], [0], [1], [0, 0, 1, 1], [], []>} : vector<16x8xbf16>, vector<8x16xbf16>, vector<16x16xf32> -> vector<16x16xf32>
    %c0_230 = arith.constant 0 : index
    %c0_231 = arith.constant 0 : index
    %192 = vector.load %arg14[%c0_230, %c0_231] : memref<16x1xf32, #tpu.memory_space<vmem>>, vector<16x1xf32>
    %193 = vector.broadcast %192 : vector<16x1xf32> to vector<16x16xf32>
    %194 = arith.addf %191, %193 : vector<16x16xf32>
    %cst_232 = arith.constant 0.000000e+00 : f32
    %195 = vector.broadcast %cst_232 : f32 to vector<16x16xf32>
    %196 = arith.maximumf %194, %195 : vector<16x16xf32>
    %c0_233 = arith.constant 0 : index
    %c0_234 = arith.constant 0 : index
    %c0_235 = arith.constant 0 : index
    %197 = vector.load %arg15[%c0_233, %c0_234, %c0_235] : memref<1x16x16xf32, #tpu.memory_space<vmem>>, vector<1x16x16xf32>
    %198 = vector.shape_cast %197 : vector<1x16x16xf32> to vector<16x16xf32>
    %199 = vector.shape_cast %196 : vector<16x16xf32> to vector<1x16x16xf32>
    tpu.vector_store %arg15[%c0_233, %c0_234, %c0_235], %199 {strides = array<i32>} : memref<1x16x16xf32, #tpu.memory_space<vmem>>, vector<1x16x16xf32>,
    return
  }
  func.func @transform_0(%arg0: i32) -> (i32, i32, i32) {
    %c0_i32 = arith.constant 0 : i32
    %c0_i32_0 = arith.constant 0 : i32
    %c0_i32_1 = arith.constant 0 : i32
    return %arg0, %c0_i32, %c0_i32_0 : i32, i32, i32
  }
  func.func @transform_1(%arg0: i32) -> (i32, i32, i32) {
    %c0_i32 = arith.constant 0 : i32
    %c0_i32_0 = arith.constant 0 : i32
    %c0_i32_1 = arith.constant 0 : i32
    %c0_i32_2 = arith.constant 0 : i32
    return %c0_i32, %c0_i32_0, %c0_i32_1 : i32, i32, i32
  }
  func.func @transform_2(%arg0: i32) -> (i32, i32, i32) {
    %c0_i32 = arith.constant 0 : i32
    %c0_i32_0 = arith.constant 0 : i32
    %c0_i32_1 = arith.constant 0 : i32
    %c0_i32_2 = arith.constant 0 : i32
    return %c0_i32, %c0_i32_0, %c0_i32_1 : i32, i32, i32
  }
  func.func @transform_3(%arg0: i32) -> (i32, i32, i32) {
    %c0_i32 = arith.constant 0 : i32
    %c0_i32_0 = arith.constant 0 : i32
    %c0_i32_1 = arith.constant 0 : i32
    %c0_i32_2 = arith.constant 0 : i32
    return %c0_i32, %c0_i32_0, %c0_i32_1 : i32, i32, i32
  }
  func.func @transform_4(%arg0: i32) -> (i32, i32) {
    %c0_i32 = arith.constant 0 : i32
    %c0_i32_0 = arith.constant 0 : i32
    %c0_i32_1 = arith.constant 0 : i32
    return %c0_i32, %c0_i32_0 : i32, i32
  }
  func.func @transform_5(%arg0: i32) -> (i32, i32) {
    %c0_i32 = arith.constant 0 : i32
    %c0_i32_0 = arith.constant 0 : i32
    %c0_i32_1 = arith.constant 0 : i32
    return %c0_i32, %c0_i32_0 : i32, i32
  }
  func.func @transform_6(%arg0: i32) -> (i32, i32) {
    %c0_i32 = arith.constant 0 : i32
    %c0_i32_0 = arith.constant 0 : i32
    %c0_i32_1 = arith.constant 0 : i32
    return %c0_i32, %c0_i32_0 : i32, i32
  }
  func.func @transform_7(%arg0: i32) -> (i32, i32) {
    %c0_i32 = arith.constant 0 : i32
    %c0_i32_0 = arith.constant 0 : i32
    %c0_i32_1 = arith.constant 0 : i32
    return %c0_i32, %c0_i32_0 : i32, i32
  }
  func.func @transform_8(%arg0: i32) -> (i32, i32) {
    %c0_i32 = arith.constant 0 : i32
    %c0_i32_0 = arith.constant 0 : i32
    %c0_i32_1 = arith.constant 0 : i32
    return %c0_i32, %c0_i32_0 : i32, i32
  }
  func.func @transform_9(%arg0: i32) -> (i32, i32) {
    %c0_i32 = arith.constant 0 : i32
    %c0_i32_0 = arith.constant 0 : i32
    %c0_i32_1 = arith.constant 0 : i32
    return %c0_i32, %c0_i32_0 : i32, i32
  }
  func.func @transform_10(%arg0: i32) -> (i32, i32) {
    %c0_i32 = arith.constant 0 : i32
    %c0_i32_0 = arith.constant 0 : i32
    %c0_i32_1 = arith.constant 0 : i32
    return %c0_i32, %c0_i32_0 : i32, i32
  }
  func.func @transform_11(%arg0: i32) -> (i32, i32) {
    %c0_i32 = arith.constant 0 : i32
    %c0_i32_0 = arith.constant 0 : i32
    %c0_i32_1 = arith.constant 0 : i32
    return %c0_i32, %c0_i32_0 : i32, i32
  }
  func.func @transform_12(%arg0: i32) -> (i32, i32) {
    %c0_i32 = arith.constant 0 : i32
    %c0_i32_0 = arith.constant 0 : i32
    %c0_i32_1 = arith.constant 0 : i32
    return %c0_i32, %c0_i32_0 : i32, i32
  }
  func.func @transform_13(%arg0: i32) -> (i32, i32) {
    %c0_i32 = arith.constant 0 : i32
    %c0_i32_0 = arith.constant 0 : i32
    %c0_i32_1 = arith.constant 0 : i32
    return %c0_i32, %c0_i32_0 : i32, i32
  }
  func.func @transform_14(%arg0: i32) -> (i32, i32, i32) {
    %c0_i32 = arith.constant 0 : i32
    %c0_i32_0 = arith.constant 0 : i32
    %c0_i32_1 = arith.constant 0 : i32
    return %arg0, %c0_i32, %c0_i32_0 : i32, i32, i32
  }
}

</mosaic_0001>

<bundles_post_ra>
// kernel: tpu_custom_call.1
= control target key start
LH: loop header
LB: loop body
LE: loop exit
PB: predicated region body
PF: predicated region fallthrough
CT: control target
= control target key end

     0   :  { %19 = vsyncpa [#allocation7], 0  ;;  %s7405_s0 = inlined_call_operand.vmem [shape: bf16[2,8,256], index: 0, kind: input, shape index: {}]   ;;  %s7406_s1 = inlined_call_operand.vmem [shape: bf16[9,256,64], index: 1, kind: input, shape index: {}]   ;;  %s7407_s2 = inlined_call_operand.vmem [shape: bf16[4,64,64], index: 2, kind: input, shape index: {}]   ;;  %s7408_s3 = inlined_call_operand.vmem [shape: bf16[9,64,16], index: 3, kind: input, shape index: {}]   ;;  %s7409_s4 = inlined_call_operand.vmem [shape: bf16[8,72], index: 4, kind: input, shape index: {}]   ;;  %s7410_s5 = inlined_call_operand.vmem [shape: f32[8,1], index: 5, kind: input, shape index: {}]   ;;  %s7411_s6 = inlined_call_operand.vmem [shape: bf16[8,32], index: 6, kind: input, shape index: {}]   ;;  %s7412_s7 = inlined_call_operand.vmem [shape: f32[8,1], index: 7, kind: input, shape index: {}]   ;;  %s7413_s8 = inlined_call_operand.vmem [shape: bf16[8,32], index: 8, kind: input, shape index: {}]   ;;  %s7414_s9 = inlined_call_operand.vmem [shape: f32[8,1], index: 9, kind: input, shape index: {}]   ;;  %s7415_s10 = inlined_call_operand.vmem [shape: bf16[8,144], index: 10, kind: input, shape index: {}]   ;;  %s7416_s11 = inlined_call_operand.vmem [shape: f32[8,1], index: 11, kind: input, shape index: {}]   ;;  %s7417_s12 = inlined_call_operand.vmem [shape: bf16[16,8], index: 12, kind: input, shape index: {}]   ;;  %s7418_s13 = inlined_call_operand.vmem [shape: f32[16,1], index: 13, kind: input, shape index: {}]   ;;  %s7419_s14 = inlined_call_operand.hbm [shape: f32[2,16,16], index: 14, kind: output, shape index: {}]  }
   0x1   :  { %21 = vsyncpa [#allocation7 + $0x1], 0  ;;  %s6218_s29 = smov 0   ;;  %s6220_s30 = smov 0  }
   0x2   :  { %s6222_s15 = smov 0   ;;  %s6224_s16 = smov 0  }
   0x3 LB: > { %7425 = sst [smem:[#allocation9_spill]] %s6123_s29  ;;  %s6239_s17 = sadd.s32 4294967295, %s6135_s16   ;;  %s6135_s16 = sphi %s6224_s16, %s7434_s16   ;;  %s6131_s15 = sphi %s6222_s15, %s7439_s15   ;;  %s6127_s30 = sphi %s6220_s30, %s7438_s30   ;;  %s6123_s29 = sphi %s6218_s29, %s7437_s29  }
   0x4   : > { %7426 = sst [smem:[#allocation10_spill]] %s6131_s15  ;;  %s4354_s18 = sadd.s32 4294967294, %s6135_s16  }
   0x5   : > { %s6243_s19 = sadd.s32 1, %s6135_s16   ;;  %s333_s20 = sadd.s32 1, %s6131_s15 }
   0x6   : > { %7427 = sst [smem:[#allocation11_spill]] %s6243_s19  ;;  %s330_s21 = ssub.s32 %s6135_s16, %s6243_s19 }
   0x7   : > { %p343_p0 = scmp.ne.s32.totalorder %s6131_s15, %s6127_s30  ;;  %p331_p1 = scmp.eq.s32.totalorder %s330_s21, 0 }
   0x8   : > { %p344_p2 = scmp.eq.s32.totalorder %s6239_s17, 1  ;;  %p349_p3 = scmp.ne.s32.totalorder %s6127_s30, %s6123_s29 }
   0x9   : > { %p350_p4 = scmp.eq.s32.totalorder %s4354_s18, 1  ;;  %p4357_p7 = scmp.ge.s32.totalorder %s6135_s16, 1 }
   0xa   : > { %s6254_s22 = scalar_select %p331_p1, %s6131_s15, %s333_s20  }
   0xb   : > { %p6256_p5 = por %p344_p2, %p343_p0  ;;  %p6260_p6 = por %p350_p4, %p349_p3 }
   0xc   : > { %7428 = sst [smem:[#allocation12_spill]] %s6254_s22  ;;  %p415_p8 = scmp.lt.s32.totalorder %s6135_s16, 3 }
   0xd   : > { %s7430_s24 = scalar_select %p6260_p6, 1, 0 }
   0xe   : > { %p416_p9 = pnand %p4357_p7, %p415_p8 }
   0xf   : > { %7431 = sst [smem:[#allocation13_spill]] %s7430_s24  ;;  %v5820_v0 = vld [vmem:[%s7406_s1 + $0x40] sm:$0xff] (!%p416_p9)   ;;  %v5824_v4 = vld [vmem:[%s7406_s1 + $0x48] sm:$0xff] (!%p416_p9)   ;;  %v5828_v8 = vld [vmem:[%s7406_s1 + $0x50] sm:$0xff] (!%p416_p9)   ;;  %p461_p10 = scmp.lt.s32.totalorder (!%p416_p9), %s6239_s17, 1  ;;  %vm643_vm0 = vcmask (!%p416_p9), 523264  }
  0x10   : > { %419 = sbr.rel (%p416_p9) target bundleno = 2366 (0x93e), region = 76  ;;  %v5821_v1 = vld [vmem:[%s7406_s1 + $0xc0] sm:$0xff] (!%p416_p9)   ;;  %5084 = vmatprep.subr.bf16.mxu0 (!%p416_p9), %v5820_v0  ;;  %v5825_v5 = vld [vmem:[%s7406_s1 + $0xc8] sm:$0xff] (!%p416_p9)   ;;  %v5829_v9 = vld [vmem:[%s7406_s1 + $0xd0] sm:$0xff] (!%p416_p9)   ;;  %vm6138_vm1 = vmmov (!%p416_p9), 0   ;;  %vm2030_vm2 = vcmask (!%p416_p9), 1043456  }
  0x11   : > { %v5822_v2 = vld [vmem:[%s7406_s1] sm:$0xff] (!%p416_p9)   ;;  %5106 = vmatprep.subr.bf16.mxu1 (!%p416_p9), %v5821_v1  ;;  %v5826_v6 = vld [vmem:[%s7406_s1 + $0x8] sm:$0xff] (!%p416_p9)   ;;  %v5830_v10 = vld [vmem:[%s7406_s1 + $0x10] sm:$0xff] (!%p416_p9)   ;;  %vm2026_vm3 = vcmask (!%p416_p9), 588800   ;;  %vm2387_vm4 = vcmask (!%p416_p9), 261120   ;;  %vm2868_vm5 = vcmask (!%p416_p9), 130048  }
  0x12   : > { %v5823_v3 = vld [vmem:[%s7406_s1 + $0x80] sm:$0xff] (!%p416_p9)   ;;  %5085 = vmatpush3.bf16.msra.mxu0 (!%p416_p9), %v5822_v2  ;;  %v5827_v7 = vld [vmem:[%s7406_s1 + $0x88] sm:$0xff] (!%p416_p9)   ;;  %v5831_v11 = vld [vmem:[%s7406_s1 + $0x90] sm:$0xff] (!%p416_p9)   ;;  %vm4226_vm6 = vcmask (!%p416_p9), 64512   ;;  %s458_s24 = sand.u32 (!%p416_p9), 1, %s6127_s30  }
  0x13   : > { %5107 = vmatpush3.bf16.msra.mxu1 (!%p416_p9), %v5823_v3  ;;  %5086 = vmatprep.subr.bf16.mxu0 (!%p416_p9), %v5824_v4  ;;  %v5832_v12 = vld [vmem:[%s7406_s1 + $0x58] sm:$0xff] (!%p416_p9)   ;;  %v5836_v16 = vld [vmem:[%s7406_s1 + $0x60] sm:$0xff] (!%p416_p9)   ;;  %v5840_v20 = vld [vmem:[%s7406_s1 + $0x68] sm:$0xff] (!%p416_p9)   ;;  %s4358_s21 = sshll.u32 (!%p416_p9), %s458_s24, 4 }
  0x14   : > { %5108 = vmatprep.subr.bf16.mxu1 (!%p416_p9), %v5825_v5  ;;  %v5833_v13 = vld [vmem:[%s7406_s1 + $0xd8] sm:$0xff] (!%p416_p9)   ;;  %v5837_v17 = vld [vmem:[%s7406_s1 + $0xe0] sm:$0xff] (!%p416_p9)   ;;  %v5841_v21 = vld [vmem:[%s7406_s1 + $0xe8] sm:$0xff] (!%p416_p9)   ;;  %s460_s15 = scalar_lea.vmem (!%p416_p9), [#allocation6], %s4358_s21 }
  0x15   : > { %v5834_v14 = vld [vmem:[%s7406_s1 + $0x18] sm:$0xff] (!%p416_p9)   ;;  %v5838_v18 = vld [vmem:[%s7406_s1 + $0x20] sm:$0xff] (!%p416_p9)   ;;  %v5842_v22 = vld [vmem:[%s7406_s1 + $0x28] sm:$0xff] (!%p416_p9)   ;;  %s4292_s29 = sshll.u32 (!%p416_p9), %s460_s15, 4  ;;  %s7355_s29 = int_to_ptr.vmem [resolvable:$true] %s4292_s29 }
  0x16   : > { %5087 = vmatpush3.bf16.msra.mxu0 (!%p416_p9), %v5826_v6  ;;  %v5835_v15 = vld [vmem:[%s7406_s1 + $0x98] sm:$0xff] (!%p416_p9)   ;;  %v5839_v19 = vld [vmem:[%s7406_s1 + $0xa0] sm:$0xff] (!%p416_p9)   ;;  %v5843_v23 = vld [vmem:[%s7406_s1 + $0xa8] sm:$0xff] (!%p416_p9)   ;;  %s6073_s27 = scalar_lea.vmem (!%p416_p9), %s7355_s29, 256 }
  0x17   : > { %5109 = vmatpush3.bf16.msra.mxu1 %v5827_v7  ;;  %5088 = vmatprep.subr.bf16.mxu0 %v5828_v8  ;;  %s462_s22 = scalar_select %p461_p10, %s6239_s17, 1  ;;  %v5844_v24 = vld [vmem:[%s7406_s1 + $0x70] sm:$0xff]   ;;  %v5848_v28 = vld [vmem:[%s7406_s1 + $0x78] sm:$0xff]   ;;  %v5854_v35 = vld [vmem:[%s7406_s1 + $0x140] sm:$0xff]  }
  0x18   : > { %5110 = vmatprep.subr.bf16.mxu1 %v5829_v9  ;;  %v5845_v25 = vld [vmem:[%s7406_s1 + $0xf0] sm:$0xff]   ;;  %v5849_v29 = vld [vmem:[%s7406_s1 + $0xf8] sm:$0xff]   ;;  %v5855_v36 = vld [vmem:[%s7406_s1 + $0x1c0] sm:$0xff]   ;;  %p6074_p11 = scmp.ne.s32.totalorder %s7355_s29, %s6073_s27 }
  0x19   : > { %v5846_v26 = vld [vmem:[%s7406_s1 + $0x30] sm:$0xff]   ;;  %s5082_s20 = sshll.u32 %s462_s22, 3  ;;  %v5850_v30 = vld [vmem:[%s7406_s1 + $0x38] sm:$0xff]   ;;  %v5856_v37 = vld [vmem:[%s7406_s1 + $0x100] sm:$0xff]  }
  0x1a   : > { %5089 = vmatpush3.bf16.msra.mxu0 %v5830_v10  ;;  %v5847_v27 = vld [vmem:[%s7406_s1 + $0xb0] sm:$0xff]   ;;  %s465_s28 = scalar_lea.vmem %s7405_s0, %s5082_s20  ;;  %v5851_v31 = vld [vmem:[%s7406_s1 + $0xb8] sm:$0xff]   ;;  %v5857_v38 = vld [vmem:[%s7406_s1 + $0x180] sm:$0xff]   ;;  %s5083_s20 = sshll.u32 %s6239_s17, 8 }
  0x1b   : > { %5111 = vmatpush3.bf16.msra.mxu1 %v5831_v11  ;;  %5090 = vmatprep.subr.bf16.mxu0 %v5832_v12  ;;  %v467_v32 = vld [vmem:[%s465_s28] sm:$0xff]  ;;  %v5858_v39 = vld [vmem:[%s7406_s1 + $0x148] sm:$0xff]   ;;  %v5862_v43 = vld [vmem:[%s7406_s1 + $0x150] sm:$0xff]   ;;  %s7360_s26 = scalar_lea.hbm %s7419_s14, %s5083_s20  ;;  %s7364_s17 = scalar_lea.sflag [#allocation7], %s458_s24 }
  0x1c   : > { %5112 = vmatprep.subr.bf16.mxu1 %v5833_v13  ;;  %v6367_v33 = vcombine.high %v467_v32, %v467_v32  ;;  %v6369_v34 = vcombine.low %v467_v32, %v467_v32  ;;  %v5859_v40 = vld [vmem:[%s7406_s1 + $0x1c8] sm:$0xff]   ;;  %v5863_v44 = vld [vmem:[%s7406_s1 + $0x1d0] sm:$0xff]   ;;  %v5866_v47 = vld [vmem:[%s7406_s1 + $0x158] sm:$0xff]   ;;  %p6075_p12 = pnand %p6074_p11, %p6256_p5  ;;  %s6140_s28 = smov [#allocation6]  }
  0x1d   : > { %v5860_v41 = vld [vmem:[%s7406_s1 + $0x108] sm:$0xff]   ;;  %v5864_v45 = vld [vmem:[%s7406_s1 + $0x110] sm:$0xff]   ;;  %v5867_v48 = vld [vmem:[%s7406_s1 + $0x1d8] sm:$0xff]   ;;  %s6077_s22 = sshll.u32 %s6140_s28, 4  ;;  %s6078_s22 = int_to_ptr.vmem [resolvable:$false] %s6077_s22 }
  0x1e   : > { %5091 = vmatpush3.bf16.msra.mxu0 %v5834_v14  ;;  %635 = vmatprep.mubr.bf16.mxu0 %v6367_v33  ;;  %v5861_v42 = vld [vmem:[%s7406_s1 + $0x188] sm:$0xff]   ;;  %v5865_v46 = vld [vmem:[%s7406_s1 + $0x190] sm:$0xff]   ;;  %v5868_v49 = vld [vmem:[%s7406_s1 + $0x118] sm:$0xff]   ;;  %p6076_p13 = pneg %p6075_p12  ;;  %s6079_s18 = scalar_lea.vmem %s6078_s22, 512 }
  0x1f   : > { %5113 = vmatpush3.bf16.msra.mxu1 %v5835_v15  ;;  %5092 = vmatprep.subr.bf16.mxu0 %v5836_v16  ;;  %v5869_v50 = vld [vmem:[%s7406_s1 + $0x198] sm:$0xff]   ;;  %v5870_v51 = vld [vmem:[%s7406_s1 + $0x160] sm:$0xff]   ;;  %v5874_v55 = vld [vmem:[%s7406_s1 + $0x168] sm:$0xff]   ;;  %p6080_p0 = scmp.lt.s32.totalorder %s7355_s29, %s6078_s22  ;;  %p6081_p1 = scmp.lt.s32.totalorder %s6079_s18, %s6073_s27 }
  0x20   : > { %5114 = vmatprep.subr.bf16.mxu1 %v5837_v17  ;;  %806 = vmatprep.mubr.bf16.mxu1 %v6367_v33  ;;  %v5871_v52 = vld [vmem:[%s7406_s1 + $0x1e0] sm:$0xff]   ;;  %v5875_v56 = vld [vmem:[%s7406_s1 + $0x1e8] sm:$0xff]   ;;  %v5878_v59 = vld [vmem:[%s7406_s1 + $0x170] sm:$0xff]  }
  0x21   : > { %v5872_v53 = vld [vmem:[%s7406_s1 + $0x120] sm:$0xff]   ;;  %v5876_v57 = vld [vmem:[%s7406_s1 + $0x128] sm:$0xff]   ;;  %v5879_v60 = vld [vmem:[%s7406_s1 + $0x1f0] sm:$0xff]   ;;  %p6082_p2 = por %p6081_p1, %p6080_p0 }
  0x22   : > { %5093 = vmatpush3.bf16.msra.mxu0 %v5838_v18  ;;  %v5873_v54 = vld [vmem:[%s7406_s1 + $0x1a0] sm:$0xff]   ;;  %v5877_v58 = vld [vmem:[%s7406_s1 + $0x1a8] sm:$0xff]   ;;  %v5880_v61 = vld [vmem:[%s7406_s1 + $0x130] sm:$0xff]  }
  0x23   : > { %5115 = vmatpush3.bf16.msra.mxu1 %v5839_v19  ;;  %5094 = vmatprep.subr.bf16.mxu0 %v5840_v20  ;;  %v5881_v62 = vld [vmem:[%s7406_s1 + $0x1b0] sm:$0xff]   ;;  %v5882_v63 = vld [vmem:[%s7406_s1 + $0x178] sm:$0xff]   ;;  %v5886_v3 = vld [vmem:[%s7406_s1 + $0x240] sm:$0xff]   ;;  %p6083_p3 = pnand %p6082_p2, %p6076_p13 }
  0x24   : > { %5116 = vmatprep.subr.bf16.mxu1 %v5841_v21  ;;  %v5883_v0 = vld [vmem:[%s7406_s1 + $0x1f8] sm:$0xff]   ;;  %v5887_v4 = vld [vmem:[%s7406_s1 + $0x2c0] sm:$0xff]   ;;  %v5890_v7 = vld [vmem:[%s7406_s1 + $0x248] sm:$0xff]  }
  0x25   : > { %v5884_v1 = vld [vmem:[%s7406_s1 + $0x138] sm:$0xff]   ;;  %v5888_v5 = vld [vmem:[%s7406_s1 + $0x200] sm:$0xff]   ;;  %v5891_v8 = vld [vmem:[%s7406_s1 + $0x2c8] sm:$0xff]  }
  0x26   : > { %5095 = vmatpush3.bf16.msra.mxu0 %v5842_v22  ;;  %v5885_v2 = vld [vmem:[%s7406_s1 + $0x1b8] sm:$0xff]   ;;  %v5889_v6 = vld [vmem:[%s7406_s1 + $0x280] sm:$0xff]   ;;  %v5892_v9 = vld [vmem:[%s7406_s1 + $0x208] sm:$0xff]  }
  0x27   : > { %5117 = vmatpush3.bf16.msra.mxu1 %v5843_v23  ;;  %5096 = vmatprep.subr.bf16.mxu0 %v5844_v24  ;;  %v5893_v10 = vld [vmem:[%s7406_s1 + $0x288] sm:$0xff]   ;;  %v5894_v11 = vld [vmem:[%s7406_s1 + $0x250] sm:$0xff]   ;;  %v5898_v15 = vld [vmem:[%s7406_s1 + $0x258] sm:$0xff]  }
  0x28   : > { %5118 = vmatprep.subr.bf16.mxu1 %v5845_v25  ;;  %v5895_v12 = vld [vmem:[%s7406_s1 + $0x2d0] sm:$0xff]   ;;  %v5899_v16 = vld [vmem:[%s7406_s1 + $0x2d8] sm:$0xff]   ;;  %v5902_v19 = vld [vmem:[%s7406_s1 + $0x260] sm:$0xff]  }
  0x29   : > { %v5896_v13 = vld [vmem:[%s7406_s1 + $0x210] sm:$0xff]   ;;  %v5900_v17 = vld [vmem:[%s7406_s1 + $0x218] sm:$0xff]   ;;  %v5903_v20 = vld [vmem:[%s7406_s1 + $0x2e0] sm:$0xff]  }
  0x2a   : > { %5097 = vmatpush3.bf16.msra.mxu0 %v5846_v26  ;;  %v5897_v14 = vld [vmem:[%s7406_s1 + $0x290] sm:$0xff]   ;;  %v5901_v18 = vld [vmem:[%s7406_s1 + $0x298] sm:$0xff]   ;;  %v5904_v21 = vld [vmem:[%s7406_s1 + $0x220] sm:$0xff]  }
  0x2b   : > { %5119 = vmatpush3.bf16.msra.mxu1 %v5847_v27  ;;  %5098 = vmatprep.subr.bf16.mxu0 %v5848_v28  ;;  %v5905_v22 = vld [vmem:[%s7406_s1 + $0x2a0] sm:$0xff]   ;;  %v5906_v23 = vld [vmem:[%s7406_s1 + $0x268] sm:$0xff]   ;;  %v5910_v27 = vld [vmem:[%s7406_s1 + $0x270] sm:$0xff]  }
  0x2c   : > { %5120 = vmatprep.subr.bf16.mxu1 %v5849_v29  ;;  %v5907_v24 = vld [vmem:[%s7406_s1 + $0x2e8] sm:$0xff]   ;;  %v5911_v28 = vld [vmem:[%s7406_s1 + $0x2f0] sm:$0xff]   ;;  %v5915_v32 = vld [vmem:[%s7406_s1 + $0x2f8] sm:$0xff]  }
  0x2d   : > { %v5908_v25 = vld [vmem:[%s7406_s1 + $0x228] sm:$0xff]   ;;  %v5912_v29 = vld [vmem:[%s7406_s1 + $0x230] sm:$0xff]  }
  0x2e   : > { %5099 = vmatpush3.bf16.msra.mxu0 %v5850_v30  ;;  %v5909_v26 = vld [vmem:[%s7406_s1 + $0x2a8] sm:$0xff]   ;;  %v5913_v30 = vld [vmem:[%s7406_s1 + $0x2b0] sm:$0xff]  }
  0x2f   : > { %5121 = vmatpush3.bf16.msra.mxu1 %v5851_v31  ;;  %5128 = vmatprep.subr.bf16.mxu0 %v5854_v35  ;;  %v5914_v31 = vld [vmem:[%s7406_s1 + $0x278] sm:$0xff]  }
  0x30   : > { %5150 = vmatprep.subr.bf16.mxu1 %v5855_v36  ;;  %v5916_v35 = vld [vmem:[%s7406_s1 + $0x238] sm:$0xff]  }
  0x31   : > { %636 = vmatmul.mubr.bf16.vlgmr.msra.gmra.mrb[0].mxu0 %v6369_v34  ;;  %v5917_v36 = vld [vmem:[%s7406_s1 + $0x2b8] sm:$0xff]  }
  0x32   : > { %807 = vmatmul.mubr.bf16.vlgmr.msra.gmra.mrb[0].mxu1 %v6369_v34  ;;  %5129 = vmatpush3.bf16.msra.mxu0 %v5856_v37  ;;  %v5918_v37 = vld [vmem:[%s7406_s1 + $0x340] sm:$0xff]  }
  0x33   : > { %5151 = vmatpush3.bf16.msra.mxu1 %v5857_v38  ;;  %5130 = vmatprep.subr.bf16.mxu0 %v5858_v39  ;;  %v5919_v38 = vld [vmem:[%s7406_s1 + $0x3c0] sm:$0xff]  }
  0x34   : > { %976 = vmatprep.mubr.bf16.mxu0 %v6367_v33  ;;  %5152 = vmatprep.subr.bf16.mxu1 %v5859_v40  ;;  %v5920_v39 = vld [vmem:[%s7406_s1 + $0x300] sm:$0xff]  }
  0x35   : > { %1146 = vmatprep.mubr.bf16.mxu1 %v6367_v33  ;;  %v5921_v40 = vld [vmem:[%s7406_s1 + $0x380] sm:$0xff]  }
  0x36   : > { %5131 = vmatpush3.bf16.msra.mxu0 %v5860_v41  ;;  %v5922_v41 = vld [vmem:[%s7406_s1 + $0x348] sm:$0xff]  }
  0x37   : > { %5153 = vmatpush3.bf16.msra.mxu1 %v5861_v42  ;;  %5132 = vmatprep.subr.bf16.mxu0 %v5862_v43  ;;  %v5923_v42 = vld [vmem:[%s7406_s1 + $0x3c8] sm:$0xff]  }
  0x38   : > { %5154 = vmatprep.subr.bf16.mxu1 %v5863_v44  ;;  %v5924_v43 = vld [vmem:[%s7406_s1 + $0x308] sm:$0xff]  }
  0x39   : > { %v5925_v44 = vld [vmem:[%s7406_s1 + $0x388] sm:$0xff]  }
  0x3a   : > { %5133 = vmatpush3.bf16.msra.mxu0 %v5864_v45  ;;  %v5926_v45 = vld [vmem:[%s7406_s1 + $0x350] sm:$0xff]  }
  0x3b   : > { %5155 = vmatpush3.bf16.msra.mxu1 %v5865_v46  ;;  %5134 = vmatprep.subr.bf16.mxu0 %v5866_v47  ;;  %v5927_v46 = vld [vmem:[%s7406_s1 + $0x3d0] sm:$0xff]  }
  0x3c   : > { %5156 = vmatprep.subr.bf16.mxu1 %v5867_v48  ;;  %v5928_v47 = vld [vmem:[%s7406_s1 + $0x310] sm:$0xff]  }
  0x3d   : > { %v5929_v48 = vld [vmem:[%s7406_s1 + $0x390] sm:$0xff]  }
  0x3e   : > { %5135 = vmatpush3.bf16.msra.mxu0 %v5868_v49  ;;  %v5930_v49 = vld [vmem:[%s7406_s1 + $0x358] sm:$0xff]  }
  0x3f   : > { %5157 = vmatpush3.bf16.msra.mxu1 %v5869_v50  ;;  %5136 = vmatprep.subr.bf16.mxu0 %v5870_v51  ;;  %v5931_v50 = vld [vmem:[%s7406_s1 + $0x3d8] sm:$0xff]  }
  0x40   : > { %5158 = vmatprep.subr.bf16.mxu1 %v5871_v52  ;;  %v5932_v51 = vld [vmem:[%s7406_s1 + $0x318] sm:$0xff]  }
  0x41   : > { %v5933_v52 = vld [vmem:[%s7406_s1 + $0x398] sm:$0xff]  }
  0x42   : > { %5137 = vmatpush3.bf16.msra.mxu0 %v5872_v53  ;;  %v5934_v53 = vld [vmem:[%s7406_s1 + $0x360] sm:$0xff]  }
  0x43   : > { %5159 = vmatpush3.bf16.msra.mxu1 %v5873_v54  ;;  %5138 = vmatprep.subr.bf16.mxu0 %v5874_v55  ;;  %v5935_v54 = vld [vmem:[%s7406_s1 + $0x3e0] sm:$0xff]  }
  0x44   : > { %5160 = vmatprep.subr.bf16.mxu1 %v5875_v56  ;;  %v5936_v55 = vld [vmem:[%s7406_s1 + $0x320] sm:$0xff]  }
  0x45   : > { %v5937_v56 = vld [vmem:[%s7406_s1 + $0x3a0] sm:$0xff]  }
  0x46   : > { %5139 = vmatpush3.bf16.msra.mxu0 %v5876_v57  ;;  %v5938_v57 = vld [vmem:[%s7406_s1 + $0x368] sm:$0xff]  }
  0x47   : > { %5161 = vmatpush3.bf16.msra.mxu1 %v5877_v58  ;;  %5140 = vmatprep.subr.bf16.mxu0 %v5878_v59  ;;  %v5939_v58 = vld [vmem:[%s7406_s1 + $0x3e8] sm:$0xff]  }
  0x48   : > { %5162 = vmatprep.subr.bf16.mxu1 %v5879_v60  ;;  %v5940_v59 = vld [vmem:[%s7406_s1 + $0x328] sm:$0xff]  }
  0x49   : > { %v5941_v60 = vld [vmem:[%s7406_s1 + $0x3a8] sm:$0xff]  }
  0x4a   : > { %5141 = vmatpush3.bf16.msra.mxu0 %v5880_v61  ;;  %v5942_v61 = vld [vmem:[%s7406_s1 + $0x370] sm:$0xff]  }
  0x4b   : > { %5163 = vmatpush3.bf16.msra.mxu1 %v5881_v62  ;;  %5142 = vmatprep.subr.bf16.mxu0 %v5882_v63  ;;  %v5943_v62 = vld [vmem:[%s7406_s1 + $0x3f0] sm:$0xff]  }
  0x4c   : > { %5164 = vmatprep.subr.bf16.mxu1 %v5883_v0  ;;  %v5944_v63 = vld [vmem:[%s7406_s1 + $0x330] sm:$0xff]  }
  0x4d   : > { %v5945_v0 = vld [vmem:[%s7406_s1 + $0x3b0] sm:$0xff]  }
  0x4e   : > { %5143 = vmatpush3.bf16.msra.mxu0 %v5884_v1  ;;  %v5946_v1 = vld [vmem:[%s7406_s1 + $0x378] sm:$0xff]  }
  0x4f   : > { %5165 = vmatpush3.bf16.msra.mxu1 %v5885_v2  ;;  %5172 = vmatprep.subr.bf16.mxu0 %v5886_v3  ;;  %v5947_v2 = vld [vmem:[%s7406_s1 + $0x3f8] sm:$0xff]  }
  0x50   : > { %5194 = vmatprep.subr.bf16.mxu1 %v5887_v4  ;;  %v5948_v3 = vld [vmem:[%s7406_s1 + $0x338] sm:$0xff]  }
  0x51   : > { %977 = vmatmul.mubr.bf16.vlgmr.msra.gmra.mrb[4].mxu0 %v6369_v34  ;;  %v5949_v4 = vld [vmem:[%s7406_s1 + $0x3b8] sm:$0xff]  }
  0x52   : > { %1147 = vmatmul.mubr.bf16.vlgmr.msra.gmra.mrb[4].mxu1 %v6369_v34  ;;  %5173 = vmatpush3.bf16.msra.mxu0 %v5888_v5  ;;  %v5950_v5 = vld [vmem:[%s7406_s1 + $0x440] sm:$0xff]  }
  0x53   : > { %5195 = vmatpush3.bf16.msra.mxu1 %v5889_v6  ;;  %5174 = vmatprep.subr.bf16.mxu0 %v5890_v7  ;;  %v5951_v6 = vld [vmem:[%s7406_s1 + $0x400] sm:$0xff]   ;;  %v5952_v7 = vld [vmem:[%s7406_s1 + $0x448] sm:$0xff]  }
  0x54   : > { %1316 = vmatprep.mubr.bf16.mxu0 %v6367_v33  ;;  %5196 = vmatprep.subr.bf16.mxu1 %v5891_v8  ;;  %v6137_v8 = vmov 0.0  }
  0x55   : > { %1486 = vmatprep.mubr.bf16.mxu1 %v6367_v33 }
  0x56   : > { %5175 = vmatpush3.bf16.msra.mxu0 %v5892_v9  ;;  %v5953_v9 = vld [vmem:[%s7406_s1 + $0x408] sm:$0xff]  }
  0x57   : > { %5197 = vmatpush3.bf16.msra.mxu1 %v5893_v10  ;;  %5176 = vmatprep.subr.bf16.mxu0 %v5894_v11  ;;  %v5954_v10 = vld [vmem:[%s7406_s1 + $0x450] sm:$0xff]  }
  0x58   : > { %5198 = vmatprep.subr.bf16.mxu1 %v5895_v12  ;;  %v5955_v11 = vld [vmem:[%s7406_s1 + $0x410] sm:$0xff]   ;;  %v5956_v12 = vld [vmem:[%s7406_s1 + $0x458] sm:$0xff]  }
  0x5a   : > { %5177 = vmatpush3.bf16.msra.mxu0 %v5896_v13  ;;  %v5958_v13 = vld [vmem:[%s7406_s1 + $0x460] sm:$0xff]  }
  0x5b   : > { %5199 = vmatpush3.bf16.msra.mxu1 %v5897_v14  ;;  %5178 = vmatprep.subr.bf16.mxu0 %v5898_v15  ;;  %v5959_v14 = vld [vmem:[%s7406_s1 + $0x420] sm:$0xff]   ;;  %v5960_v15 = vld [vmem:[%s7406_s1 + $0x468] sm:$0xff]  }
  0x5c   : > { %5200 = vmatprep.subr.bf16.mxu1 %v5899_v16  ;;  %v5961_v16 = vld [vmem:[%s7406_s1 + $0x428] sm:$0xff]  }
  0x5e   : > { %5179 = vmatpush3.bf16.msra.mxu0 %v5900_v17  ;;  %v5962_v17 = vld [vmem:[%s7406_s1 + $0x470] sm:$0xff]  }
  0x5f   : > { %5201 = vmatpush3.bf16.msra.mxu1 %v5901_v18  ;;  %5180 = vmatprep.subr.bf16.mxu0 %v5902_v19  ;;  %v5963_v18 = vld [vmem:[%s7406_s1 + $0x430] sm:$0xff]   ;;  %v5964_v19 = vld [vmem:[%s7406_s1 + $0x478] sm:$0xff]  }
  0x60   : > { %5202 = vmatprep.subr.bf16.mxu1 %v5903_v20  ;;  %v5965_v20 = vld [vmem:[%s7406_s1 + $0x438] sm:$0xff]  }
  0x62   : > { %5181 = vmatpush3.bf16.msra.mxu0 %v5904_v21 }
  0x63   : > { %5203 = vmatpush3.bf16.msra.mxu1 %v5905_v22  ;;  %5182 = vmatprep.subr.bf16.mxu0 %v5906_v23 }
  0x64   : > { %5204 = vmatprep.subr.bf16.mxu1 %v5907_v24 }
  0x66   : > { %5183 = vmatpush3.bf16.msra.mxu0 %v5908_v25 }
  0x67   : > { %5205 = vmatpush3.bf16.msra.mxu1 %v5909_v26  ;;  %5184 = vmatprep.subr.bf16.mxu0 %v5910_v27 }
  0x68   : > { %5206 = vmatprep.subr.bf16.mxu1 %v5911_v28 }
  0x6a   : > { %5185 = vmatpush3.bf16.msra.mxu0 %v5912_v29 }
  0x6b   : > { %5207 = vmatpush3.bf16.msra.mxu1 %v5913_v30  ;;  %5186 = vmatprep.subr.bf16.mxu0 %v5914_v31 }
  0x6c   : > { %5208 = vmatprep.subr.bf16.mxu1 %v5915_v32 }
  0x6e   : > { %5187 = vmatpush3.bf16.msra.mxu0 %v5916_v35 }
  0x6f   : > { %5209 = vmatpush3.bf16.msra.mxu1 %v5917_v36  ;;  %5216 = vmatprep.subr.bf16.mxu0 %v5918_v37  ;;  %v6139_v36 = vmov 0   ;;  %v5967_v37 = vld [vmem:[%s7407_s2 + $0x60] sm:$0xff]  }
  0x70   : > { %5238 = vmatprep.subr.bf16.mxu1 %v5919_v38  ;;  %5818 = vset.pattern.permute.xlu0 %v6139_v36  ;;  %v2381_v38 = vld [vmem:[%s7412_s7] sm:$0xff] }
  0x71   : > { %1317 = vmatmul.mubr.bf16.vlgmr.msra.gmra.mrb[8].mxu0 %v6369_v34  ;;  %5819 = vset.pattern.permute.xlu1 %v6139_v36 }
  0x72   : > { %1487 = vmatmul.mubr.bf16.vlgmr.msra.gmra.mrb[8].mxu1 %v6369_v34  ;;  %5217 = vmatpush3.bf16.msra.mxu0 %v5920_v39  ;;  %v5969_v39 = vld [vmem:[%s7407_s2 + $0x68] sm:$0xff]  }
  0x73   : > { %5239 = vmatpush3.bf16.msra.mxu1 %v5921_v40  ;;  %5218 = vmatprep.subr.bf16.mxu0 %v5922_v41  ;;  %v4209_v40 = vld [vmem:[%s7418_s13] sm:$0xff] }
  0x74   : > { %1656 = vmatprep.mubr.bf16.mxu0 %v6367_v33  ;;  %5240 = vmatprep.subr.bf16.mxu1 %v5923_v42 }
  0x75   : > { %1826 = vmatprep.mubr.bf16.mxu1 %v6367_v33 }
  0x76   : > { %5219 = vmatpush3.bf16.msra.mxu0 %v5924_v43 }
  0x77   : > { %5241 = vmatpush3.bf16.msra.mxu1 %v5925_v44  ;;  %5220 = vmatprep.subr.bf16.mxu0 %v5926_v45 }
  0x78   : > { %5242 = vmatprep.subr.bf16.mxu1 %v5927_v46 }
  0x7a   : > { %5221 = vmatpush3.bf16.msra.mxu0 %v5928_v47 }
  0x7b   : > { %5243 = vmatpush3.bf16.msra.mxu1 %v5929_v48  ;;  %5222 = vmatprep.subr.bf16.mxu0 %v5930_v49 }
  0x7c   : > { %5244 = vmatprep.subr.bf16.mxu1 %v5931_v50 }
  0x7e   : > { %5223 = vmatpush3.bf16.msra.mxu0 %v5932_v51 }
  0x7f   : > { %5245 = vmatpush3.bf16.msra.mxu1 %v5933_v52  ;;  %5224 = vmatprep.subr.bf16.mxu0 %v5934_v53 }
  0x80   : > { %5246 = vmatprep.subr.bf16.mxu1 %v5935_v54 }
  0x82   : > { %5225 = vmatpush3.bf16.msra.mxu0 %v5936_v55 }
  0x83   : > { %5247 = vmatpush3.bf16.msra.mxu1 %v5937_v56  ;;  %5226 = vmatprep.subr.bf16.mxu0 %v5938_v57 }
  0x84   : > { %5248 = vmatprep.subr.bf16.mxu1 %v5939_v58 }
  0x86   : > { %5227 = vmatpush3.bf16.msra.mxu0 %v5940_v59 }
  0x87   : > { %5249 = vmatpush3.bf16.msra.mxu1 %v5941_v60  ;;  %5228 = vmatprep.subr.bf16.mxu0 %v5942_v61 }
  0x88   : > { %5250 = vmatprep.subr.bf16.mxu1 %v5943_v62 }
  0x8a   : > { %5229 = vmatpush3.bf16.msra.mxu0 %v5944_v63 }
  0x8b   : > { %5251 = vmatpush3.bf16.msra.mxu1 %v5945_v0  ;;  %5230 = vmatprep.subr.bf16.mxu0 %v5946_v1 }
  0x8c   : > { %5252 = vmatprep.subr.bf16.mxu1 %v5947_v2 }
  0x8e   : > { %5231 = vmatpush3.bf16.msra.mxu0 %v5948_v3 }
  0x8f   : > { %5253 = vmatpush3.bf16.msra.mxu1 %v5949_v4  ;;  %5260 = vmatprep.subr.bf16.mxu0 %v5950_v5 }
  0x90   : > { %5426 = vmatprep.subr.bf16.mxu1 %v6137_v8 }
  0x91   : > { %1657 = vmatmul.mubr.bf16.vlgmr.msra.gmra.mrb[12].mxu0 %v6369_v34 }
  0x92   : > { %1827 = vmatmul.mubr.bf16.vlgmr.msra.gmra.mrb[12].mxu1 %v6369_v34  ;;  %5261 = vmatpush3.bf16.msra.mxu0 %v5951_v6 }
  0x93   : > { %1996 = vmatprep.mubr.bf16.mxu0 %v6367_v33  ;;  %5262 = vmatprep.subr.bf16.mxu0 %v5952_v7  ;;  %v5957_v33 = vld [vmem:[%s7406_s1 + $0x418] sm:$0xff]  }
  0x94   : > { %5436 = vmatprep.mubr.msk.bf16.mxu1 %vm6138_vm1, %v6137_v8 }
  0x96   : > { %5263 = vmatpush3.bf16.msra.mxu0 %v5953_v9 }
  0x97   : > { %5264 = vmatprep.subr.bf16.mxu0 %v5954_v10 }
  0x9a   : > { %5265 = vmatpush3.bf16.msra.mxu0 %v5955_v11 }
  0x9b   : > { %5266 = vmatprep.subr.bf16.mxu0 %v5956_v12 }
  0x9e   : > { %5267 = vmatpush3.bf16.msra.mxu0 %v5957_v33 }
  0x9f   : > { %5268 = vmatprep.subr.bf16.mxu0 %v5958_v13 }
  0xa2   : > { %5269 = vmatpush3.bf16.msra.mxu0 %v5959_v14 }
  0xa3   : > { %5270 = vmatprep.subr.bf16.mxu0 %v5960_v15 }
  0xa6   : > { %5271 = vmatpush3.bf16.msra.mxu0 %v5961_v16 }
  0xa7   : > { %5272 = vmatprep.subr.bf16.mxu0 %v5962_v17 }
  0xaa   : > { %5273 = vmatpush3.bf16.msra.mxu0 %v5963_v18 }
  0xab   : > { %5274 = vmatprep.subr.bf16.mxu0 %v5964_v19 }
  0xae   : > { %5275 = vmatpush3.bf16.msra.mxu0 %v5965_v20 }
  0xaf   : > { %5476 = vmatprep.subr.bf16.mxu0 %v6137_v8 }
  0xb1   : > { %1997 = vmatmul.mubr.bf16.vlgmr.msra.gmra.mrb[16].mxu0 %v6369_v34  ;;  %v2020_v34 = vld [vmem:[%s7410_s5] sm:$0xff] }
  0xb2   : > { %5484 = vmatprep.mubr.msk.bf16.mxu0 %vm6138_vm1, %v6137_v8  ;;  %2023 = vperm.xlu0 %5818, %v2020_v34  }
  0xb3   : > { %5477 = vmatpush3.bf16.msra.mxu0 %v5967_v37 }
  0xb4   : > { %5478 = vmatprep.subr.bf16.mxu0 %v6137_v8 }
  0xb6   : > { %2384 = vperm.xlu0 %5818, %v2381_v38  }
  0xb7   : > { %5479 = vmatpush3.bf16.msra.mxu0 %v5969_v39 }
  0xb8   : > { %5480 = vmatprep.subr.bf16.mxu0 %v6137_v8 }
  0xba   : > { %4213 = vperm.xlu0 %5818, %v4209_v40   ;;  %v5974_v40 = vld [vmem:[%s7407_s2 + $0x20] sm:$0xff]  }
 0x104   : > { %v5100_v21 = vpop.f32.mrb[0].mxu0 }
 0x105   : > { %v5122_v22 = vpop.f32.mrb[0].mxu1  ;;  %v5101_v23 = vpop.f32.mrb[1].mxu0 }
 0x106   : > { %v5123_v24 = vpop.f32.mrb[1].mxu1  ;;  %v5102_v25 = vadd.f32 %v5101_v23, %v5100_v21  ;;  %v5103_v27 = vpop.f32.mrb[2].mxu0 }
 0x107   : > { %v5124_v26 = vadd.f32 %v5123_v24, %v5122_v22  ;;  %v5125_v28 = vpop.f32.mrb[2].mxu1  ;;  %v5104_v29 = vpop.f32.mrb[3].mxu0  ;;  %v2005_v24 = vld [vmem:[%s7409_s4] sm:$0xf]  ;;  %v5970_v27 = vld [vmem:[%s7407_s2 + $0x10] sm:$0xff]  }
 0x108   : > { %v5126_v30 = vpop.f32.mrb[3].mxu1  ;;  %644 = vst.msk [vmem:[#allocation2] sm:$0xff] %vm643_vm0, %v5102_v25  ;;  %v5966_v25 = vld [vmem:[%s7407_s2] sm:$0xff]   ;;  %v5971_v28 = vld [vmem:[%s7407_s2 + $0x70] sm:$0xff]   ;;  %v5972_v29 = vld [vmem:[%s7407_s2 + $0x18] sm:$0xff]  }
 0x109   : > { %814 = vst.msk [vmem:[#allocation2 + $0x8] sm:$0xff] %vm643_vm0, %v5124_v26  ;;  %v5968_v26 = vld [vmem:[%s7407_s2 + $0x8] sm:$0xff]   ;;  %5481 = vmatpush3.bf16.msra.mxu0 %v5971_v28  ;;  %v5973_v30 = vld [vmem:[%s7407_s2 + $0x78] sm:$0xff]  }
 0x10a   : > { %5482 = vmatprep.subr.bf16.mxu0 %v6137_v8 }
 0x10d   : > { %5483 = vmatpush3.bf16.msra.mxu0 %v5973_v30  ;;  %v5993_v30 = vld [vmem:[%s7407_s2 + $0x68] sm:$0xff]  }
 0x10e   : > { %5508 = vmatprep.subr.bf16.mxu0 %v6137_v8 }
 0x10f   : > { %v2006_v31 = vld [vmem:[#allocation2] sm:$0xff] }
 0x110   : > { %v2007_v32 = vld [vmem:[#allocation2 + $0x8] sm:$0xff] }
 0x111   : > { %v2015_v35 = vpack.c.bf16 %v2007_v32, %v2006_v31 }
 0x113   : > { %5427 = vmatpush3.bf16.msra.mxu1 %v2015_v35 }
 0x114   : > { %5428 = vmatprep.subr.bf16.mxu1 %v6137_v8 }
 0x124   : > { %v5144_v41 = vpop.f32.mrb[4].mxu0 }
 0x125   : > { %v5166_v42 = vpop.f32.mrb[4].mxu1  ;;  %v5145_v43 = vpop.f32.mrb[5].mxu0 }
 0x126   : > { %v5167_v44 = vpop.f32.mrb[5].mxu1  ;;  %v5146_v45 = vadd.f32 %v5145_v43, %v5144_v41  ;;  %v5147_v47 = vpop.f32.mrb[6].mxu0  ;;  %v5976_v43 = vld [vmem:[%s7407_s2 + $0x30] sm:$0xff]  }
 0x127   : > { %v5168_v46 = vadd.f32 %v5167_v44, %v5166_v42  ;;  %v5169_v48 = vpop.f32.mrb[6].mxu1  ;;  %v5148_v49 = vpop.f32.mrb[7].mxu0  ;;  %v5975_v42 = vld [vmem:[%s7407_s2 + $0x28] sm:$0xff]   ;;  %v5977_v44 = vld [vmem:[%s7407_s2 + $0x38] sm:$0xff]   ;;  %v5980_v47 = vld [vmem:[%s7407_s2 + $0x50] sm:$0xff]  }
 0x128   : > { %v5170_v50 = vpop.f32.mrb[7].mxu1  ;;  %984 = vst.msk [vmem:[#allocation2 + $0x10] sm:$0xff] %vm643_vm0, %v5146_v45  ;;  %v5978_v45 = vld [vmem:[%s7407_s2 + $0x40] sm:$0xff]   ;;  %v5981_v48 = vld [vmem:[%s7407_s2 + $0x58] sm:$0xff]  }
 0x129   : > { %1154 = vst.msk [vmem:[#allocation2 + $0x18] sm:$0xff] %vm643_vm0, %v5168_v46  ;;  %v5979_v46 = vld [vmem:[%s7407_s2 + $0x48] sm:$0xff]   ;;  %v5983_v49 = vld [vmem:[%s7407_s2 + $0x20] sm:$0xff]  }
 0x12a   : > { %v5985_v50 = vld [vmem:[%s7407_s2 + $0x28] sm:$0xff]  }
 0x12f   : > { %v2008_v51 = vld [vmem:[#allocation2 + $0x10] sm:$0xff] }
 0x130   : > { %v2009_v52 = vld [vmem:[#allocation2 + $0x18] sm:$0xff] }
 0x131   : > { %v2016_v53 = vpack.c.bf16 %v2009_v52, %v2008_v51  ;;  %v2024_v31 = vpop.permute.xlu0 %2023  ;;  %v5987_v51 = vld [vmem:[%s7407_s2 + $0x30] sm:$0xff]  }
 0x133   : > { %5429 = vmatpush3.bf16.msra.mxu1 %v2016_v53 }
 0x134   : > { %5430 = vmatprep.subr.bf16.mxu1 %v6137_v8 }
 0x144   : > { %v5188_v54 = vpop.f32.mrb[8].mxu0 }
 0x145   : > { %v5210_v55 = vpop.f32.mrb[8].mxu1  ;;  %v5189_v56 = vpop.f32.mrb[9].mxu0 }
 0x146   : > { %v5211_v57 = vpop.f32.mrb[9].mxu1  ;;  %v5190_v58 = vadd.f32 %v5189_v56, %v5188_v54  ;;  %v5191_v60 = vpop.f32.mrb[10].mxu0 }
 0x147   : > { %v5212_v59 = vadd.f32 %v5211_v57, %v5210_v55  ;;  %v5213_v61 = vpop.f32.mrb[10].mxu1  ;;  %v5192_v62 = vpop.f32.mrb[11].mxu0 }
 0x148   : > { %v5214_v63 = vpop.f32.mrb[11].mxu1  ;;  %1324 = vst.msk [vmem:[#allocation2 + $0x20] sm:$0xff] %vm643_vm0, %v5190_v58 }
 0x149   : > { %1494 = vst.msk [vmem:[#allocation2 + $0x28] sm:$0xff] %vm643_vm0, %v5212_v59 }
 0x14f   : > { %v2010_v0 = vld [vmem:[#allocation2 + $0x20] sm:$0xff] }
 0x150   : > { %v2011_v1 = vld [vmem:[#allocation2 + $0x28] sm:$0xff] }
 0x151   : > { %v2017_v2 = vpack.c.bf16 %v2011_v1, %v2010_v0 }
 0x153   : > { %5431 = vmatpush3.bf16.msra.mxu1 %v2017_v2 }
 0x154   : > { %5432 = vmatprep.subr.bf16.mxu1 %v6137_v8 }
 0x164   : > { %v5232_v3 = vpop.f32.mrb[12].mxu0 }
 0x165   : > { %v5254_v4 = vpop.f32.mrb[12].mxu1  ;;  %v5233_v5 = vpop.f32.mrb[13].mxu0 }
 0x166   : > { %v5255_v6 = vpop.f32.mrb[13].mxu1  ;;  %v5234_v7 = vadd.f32 %v5233_v5, %v5232_v3  ;;  %v5235_v10 = vpop.f32.mrb[14].mxu0 }
 0x167   : > { %v5256_v9 = vadd.f32 %v5255_v6, %v5254_v4  ;;  %v5257_v11 = vpop.f32.mrb[14].mxu1  ;;  %v5236_v12 = vpop.f32.mrb[15].mxu0 }
 0x168   : > { %v5258_v33 = vpop.f32.mrb[15].mxu1  ;;  %1664 = vst.msk [vmem:[#allocation2 + $0x30] sm:$0xff] %vm643_vm0, %v5234_v7 }
 0x169   : > { %1834 = vst.msk [vmem:[#allocation2 + $0x38] sm:$0xff] %vm643_vm0, %v5256_v9 }
 0x16f   : > { %v2012_v13 = vld [vmem:[#allocation2 + $0x30] sm:$0xff] }
 0x170   : > { %v2013_v14 = vld [vmem:[#allocation2 + $0x38] sm:$0xff] }
 0x171   : > { %v2018_v15 = vpack.c.bf16 %v2013_v14, %v2012_v13  ;;  %v2374_v13 = vld [vmem:[%s7411_s6] sm:$0xf] }
 0x172   : > { %v5982_v14 = vld [vmem:[%s7407_s2] sm:$0xff]  }
 0x173   : > { %5433 = vmatpush3.bf16.msra.mxu1 %v2018_v15  ;;  %v5984_v15 = vld [vmem:[%s7407_s2 + $0x8] sm:$0xff]  }
 0x174   : > { %5434 = vmatprep.subr.bf16.mxu1 %v6137_v8 }
 0x184   : > { %v5276_v16 = vpop.f32.mrb[16].mxu0 }
 0x185   : > { %v5277_v17 = vpop.f32.mrb[17].mxu0 }
 0x186   : > { %v5278_v18 = vadd.f32 %v5277_v17, %v5276_v16  ;;  %v5279_v19 = vpop.f32.mrb[18].mxu0  ;;  %v5986_v16 = vld [vmem:[%s7407_s2 + $0x10] sm:$0xff]   ;;  %v5988_v17 = vld [vmem:[%s7407_s2 + $0x18] sm:$0xff]  }
 0x187   : > { %v5280_v20 = vpop.f32.mrb[19].mxu0  ;;  %v2385_v19 = vpop.permute.xlu0 %2384 }
 0x188   : > { %2004 = vst.msk [vmem:[#allocation2 + $0x40] sm:$0xff] %vm643_vm0, %v5278_v18  ;;  %v5989_v18 = vld [vmem:[%s7407_s2 + $0x38] sm:$0xff]  }
 0x18f   : > { %v2014_v21 = vld [vmem:[#allocation2 + $0x40] sm:$0xff] }
 0x190   : > { %v2019_v22 = vpack.c.bf16 %v2014_v21, %v2014_v21 }
 0x192   : > { %v2032_v23 = vsel %vm2030_vm2, %v2019_v22, 0 }
 0x193   : > { %5435 = vmatpush3.bf16.msra.mxu1 %v2032_v23 }
 0x194   : > { %5440 = vmatprep.subr.bf16.mxu1 %v6137_v8 }
 0x196   : > { %5437 = vmatmul.mubr.msk.bf16.vlgmr.msra.gmra.mrb[16].mxu1 %vm2026_vm3, %v2005_v24 }
 0x197   : > { %5441 = vmatpush3.bf16.msra.mxu1 %v5966_v25  ;;  %5448 = vmatprep.mubr.msk.bf16.mxu1 %vm6138_vm1, %v6137_v8 }
 0x198   : > { %5442 = vmatprep.subr.bf16.mxu1 %v6137_v8 }
 0x19b   : > { %5443 = vmatpush3.bf16.msra.mxu1 %v5968_v26  ;;  %v5990_v26 = vld [vmem:[%s7407_s2 + $0x40] sm:$0xff]  }
 0x19c   : > { %5444 = vmatprep.subr.bf16.mxu1 %v6137_v8 }
 0x19f   : > { %5445 = vmatpush3.bf16.msra.mxu1 %v5970_v27  ;;  %v5991_v27 = vld [vmem:[%s7407_s2 + $0x60] sm:$0xff]  }
 0x1a0   : > { %5446 = vmatprep.subr.bf16.mxu1 %v6137_v8 }
 0x1a3   : > { %5447 = vmatpush3.bf16.msra.mxu1 %v5972_v29  ;;  %v5992_v29 = vld [vmem:[%s7407_s2 + $0x48] sm:$0xff]  }
 0x1a4   : > { %5452 = vmatprep.subr.bf16.mxu1 %v6137_v8 }
 0x269   : > { %v2068_v32 = vpop.f32.mrb[16].mxu1 }
 0x26a   : > { %v2069_v35 = vadd.f32 %v2068_v32, %v2024_v31  ;;  %v5438_v34 = vpop.f32.mrb[17].mxu1  ;;  %v5994_v31 = vld [vmem:[%s7407_s2 + $0x50] sm:$0xff]  }
 0x26b   : > { %v2071_v37 = vpop.f32.mrb[18].mxu1  ;;  %v5995_v32 = vld [vmem:[%s7407_s2 + $0x70] sm:$0xff]   ;;  %v5997_v34 = vld [vmem:[%s7407_s2 + $0x78] sm:$0xff]  }
 0x26c   : > { %v2074_v38 = vmax.f32 %v2069_v35, 0.0  ;;  %v5439_v39 = vpop.f32.mrb[19].mxu1  ;;  %v5996_v35 = vld [vmem:[%s7407_s2 + $0x58] sm:$0xff]   ;;  %v5998_v37 = vld [vmem:[%s7408_s3] sm:$0xff]  }
 0x26d   : > { %v6000_v39 = vld [vmem:[%s7408_s3 + $0x10] sm:$0xff]  }
 0x26e   : > { %v2075_v41 = vpack.c.bf16 %v2074_v38, %v2074_v38  ;;  %v5999_v38 = vld [vmem:[%s7408_s3 + $0x8] sm:$0xff]  }
 0x270   : > { %5449 = vmatmul.mubr.msk.bf16.vlgmr.msra.gmra.mrb[20].mxu1 %vm643_vm0, %v2075_v41  ;;  %5485 = vmatmul.mubr.msk.bf16.vlgmr.msra.gmra.mrb[20].mxu0 %vm643_vm0, %v2075_v41 }
 0x271   : > { %5453 = vmatpush3.bf16.msra.mxu1 %v5974_v40  ;;  %5460 = vmatprep.mubr.msk.bf16.mxu1 %vm6138_vm1, %v6137_v8  ;;  %v6001_v40 = vld [vmem:[%s7408_s3 + $0x18] sm:$0xff]  }
 0x272   : > { %5454 = vmatprep.subr.bf16.mxu1 %v6137_v8  ;;  %5516 = vmatprep.mubr.msk.bf16.mxu0 %vm6138_vm1, %v6137_v8 }
 0x273   : > { %5509 = vmatpush3.bf16.msra.mxu0 %v5983_v49  ;;  %v6009_v49 = vld [vmem:[%s7408_s3 + $0x58] sm:$0xff]  }
 0x274   : > { %5510 = vmatprep.subr.bf16.mxu0 %v6137_v8 }
 0x275   : > { %5455 = vmatpush3.bf16.msra.mxu1 %v5975_v42 }
 0x276   : > { %5456 = vmatprep.subr.bf16.mxu1 %v6137_v8 }
 0x277   : > { %5511 = vmatpush3.bf16.msra.mxu0 %v5985_v50  ;;  %v6010_v50 = vld [vmem:[%s7408_s3 + $0x60] sm:$0xff]  }
 0x278   : > { %5512 = vmatprep.subr.bf16.mxu0 %v6137_v8 }
 0x279   : > { %5457 = vmatpush3.bf16.msra.mxu1 %v5976_v43  ;;  %v6003_v43 = vld [vmem:[%s7408_s3 + $0x28] sm:$0xff]  }
 0x27a   : > { %5458 = vmatprep.subr.bf16.mxu1 %v6137_v8 }
 0x27b   : > { %5513 = vmatpush3.bf16.msra.mxu0 %v5987_v51  ;;  %v6011_v51 = vld [vmem:[%s7408_s3 + $0x68] sm:$0xff]  }
 0x27c   : > { %5514 = vmatprep.subr.bf16.mxu0 %v6137_v8 }
 0x27d   : > { %5459 = vmatpush3.bf16.msra.mxu1 %v5977_v44  ;;  %v6004_v44 = vld [vmem:[%s7408_s3 + $0x30] sm:$0xff]  }
 0x27e   : > { %5464 = vmatprep.subr.bf16.mxu1 %v6137_v8 }
 0x27f   : > { %5515 = vmatpush3.bf16.msra.mxu0 %v5989_v18 }
 0x280   : > { %5461 = vmatmul.mubr.msk.bf16.vlgmr.msra.gmra.mrb[24].mxu1 %vm643_vm0, %v2075_v41  ;;  %5532 = vmatprep.subr.bf16.mxu0 %v6137_v8 }
 0x281   : > { %5465 = vmatpush3.bf16.msra.mxu1 %v5978_v45  ;;  %5472 = vmatprep.mubr.msk.bf16.mxu1 %vm6138_vm1, %v6137_v8  ;;  %v6005_v45 = vld [vmem:[%s7408_s3 + $0x38] sm:$0xff]  }
 0x282   : > { %5466 = vmatprep.subr.bf16.mxu1 %v6137_v8 }
 0x285   : > { %5467 = vmatpush3.bf16.msra.mxu1 %v5979_v46  ;;  %v6006_v46 = vld [vmem:[%s7408_s3 + $0x40] sm:$0xff]  }
 0x286   : > { %5468 = vmatprep.subr.bf16.mxu1 %v6137_v8 }
 0x289   : > { %5469 = vmatpush3.bf16.msra.mxu1 %v5980_v47  ;;  %v6007_v47 = vld [vmem:[%s7408_s3 + $0x48] sm:$0xff]  }
 0x28a   : > { %5470 = vmatprep.subr.bf16.mxu1 %v6137_v8 }
 0x28d   : > { %5471 = vmatpush3.bf16.msra.mxu1 %v5981_v48  ;;  %v6008_v48 = vld [vmem:[%s7408_s3 + $0x50] sm:$0xff]  }
 0x28e   : > { %5488 = vmatprep.subr.bf16.mxu1 %v6137_v8 }
 0x290   : > { %5473 = vmatmul.mubr.msk.bf16.vlgmr.msra.gmra.mrb[28].mxu1 %vm643_vm0, %v2075_v41  ;;  %v6002_v41 = vld [vmem:[%s7408_s3 + $0x20] sm:$0xff]  }
 0x291   : > { %5492 = vmatprep.mubr.msk.bf16.mxu1 %vm6138_vm1, %v6137_v8 }
 0x343   : > { %v2145_v52 = vpop.f32.mrb[20].mxu1  ;;  %v2367_v53 = vpop.f32.mrb[20].mxu0 }
 0x344   : > { %2151 = vst.msk [vmem:[#allocation3] sm:$0xff] %vm643_vm0, %v2145_v52  ;;  %2373 = vst.msk [vmem:[#allocation3 + $0x18] sm:$0xff] %vm643_vm0, %v2367_v53  ;;  %v5450_v54 = vpop.f32.mrb[21].mxu1  ;;  %v5486_v55 = vpop.f32.mrb[21].mxu0  ;;  %v6012_v52 = vld [vmem:[%s7408_s3 + $0x70] sm:$0xff]   ;;  %v6013_v53 = vld [vmem:[%s7408_s3 + $0x78] sm:$0xff]  }
 0x345   : > { %v2148_v56 = vpop.f32.mrb[22].mxu1  ;;  %v2370_v57 = vpop.f32.mrb[22].mxu0  ;;  %v6014_v54 = vld [vmem:[%s7408_s3 + $0x80] sm:$0xff]   ;;  %v6015_v55 = vld [vmem:[%s7408_s3 + $0x88] sm:$0xff]  }
 0x346   : > { %v5451_v58 = vpop.f32.mrb[23].mxu1  ;;  %v5487_v59 = vpop.f32.mrb[23].mxu0  ;;  %v6016_v56 = vld [vmem:[%s7408_s3 + $0x90] sm:$0xff]   ;;  %v6017_v57 = vld [vmem:[%s7408_s3 + $0x98] sm:$0xff]  }
 0x347   : > { %v6018_v58 = vld [vmem:[%s7408_s3 + $0xa0] sm:$0xff]   ;;  %v6019_v59 = vld [vmem:[%s7408_s3 + $0xa8] sm:$0xff]  }
 0x34b   : > { %v2375_v0 = vld [vmem:[#allocation3] sm:$0xff]  ;;  %v2378_v10 = vld [vmem:[#allocation3 + $0x18] sm:$0xff] }
 0x353   : > { %v2219_v60 = vpop.f32.mrb[24].mxu1 }
 0x354   : > { %2225 = vst.msk [vmem:[#allocation3 + $0x8] sm:$0xff] %vm643_vm0, %v2219_v60  ;;  %v5462_v61 = vpop.f32.mrb[25].mxu1  ;;  %v6020_v60 = vld [vmem:[%s7408_s3 + $0xb0] sm:$0xff]  }
 0x355   : > { %v2222_v62 = vpop.f32.mrb[26].mxu1  ;;  %v6021_v61 = vld [vmem:[%s7408_s3 + $0xb8] sm:$0xff]  }
 0x356   : > { %v5463_v63 = vpop.f32.mrb[27].mxu1  ;;  %v6022_v62 = vld [vmem:[%s7408_s3 + $0xc0] sm:$0xff]  }
 0x357   : > { %v6023_v63 = vld [vmem:[%s7408_s3 + $0xc8] sm:$0xff]  }
 0x35b   : > { %v2376_v1 = vld [vmem:[#allocation3 + $0x8] sm:$0xff] }
 0x35c   : > { %v2379_v2 = vpack.c.bf16 %v2376_v1, %v2375_v0  ;;  %v2435_v3 = vmax.f32 %v2375_v0, %v2376_v1  ;;  %v6024_v0 = vld [vmem:[%s7408_s3 + $0xd0] sm:$0xff]   ;;  %v6025_v1 = vld [vmem:[%s7408_s3 + $0xd8] sm:$0xff]  }
 0x35e   : > { %5489 = vmatpush3.bf16.msra.mxu1 %v2379_v2  ;;  %v6026_v2 = vld [vmem:[%s7408_s3 + $0xe0] sm:$0xff]  }
 0x35f   : > { %5490 = vmatprep.subr.bf16.mxu1 %v6137_v8 }
 0x363   : > { %v2293_v4 = vpop.f32.mrb[28].mxu1 }
 0x364   : > { %2299 = vst.msk [vmem:[#allocation3 + $0x10] sm:$0xff] %vm643_vm0, %v2293_v4  ;;  %v5474_v5 = vpop.f32.mrb[29].mxu1  ;;  %v6028_v4 = vld [vmem:[%s7408_s3 + $0xf0] sm:$0xff]  }
 0x365   : > { %v2296_v6 = vpop.f32.mrb[30].mxu1  ;;  %v6029_v5 = vld [vmem:[%s7408_s3 + $0xf8] sm:$0xff]  }
 0x366   : > { %v5475_v7 = vpop.f32.mrb[31].mxu1  ;;  %v6030_v6 = vld [vmem:[%s7408_s3 + $0x100] sm:$0xff]  }
 0x367   : > { %v6031_v7 = vld [vmem:[%s7408_s3 + $0x108] sm:$0xff]  }
 0x36b   : > { %v2377_v9 = vld [vmem:[#allocation3 + $0x10] sm:$0xff] }
 0x36c   : > { %v2380_v11 = vpack.c.bf16 %v2378_v10, %v2377_v9  ;;  %v2437_v12 = vmax.f32 %v2377_v9, %v2378_v10  ;;  %v6032_v9 = vld [vmem:[%s7408_s3 + $0x110] sm:$0xff]   ;;  %v6033_v10 = vld [vmem:[%s7408_s3 + $0x118] sm:$0xff]  }
 0x36e   : > { %5491 = vmatpush3.bf16.msra.mxu1 %v2380_v11  ;;  %v6855_v33 = vmax.f32 %v2435_v3, %v2437_v12  ;;  %v6027_v3 = vld [vmem:[%s7408_s3 + $0xe8] sm:$0xff]   ;;  %v2742_v11 = vld [vmem:[%s7414_s9] sm:$0xff] }
 0x36f   : > { %5496 = vmatprep.subr.bf16.mxu1 %v6137_v8  ;;  %2745 = vperm.xlu1 %5819, %v2742_v11   ;;  %v4150_v12 = vld [vmem:[%s7416_s11] sm:$0xff] }
 0x370   : > { %v6948_v42 = vpack.c.bf16 %v6855_v33, %v6855_v33  ;;  %v4210_v33 = vld [vmem:[%s7418_s13 + $0x8] sm:$0xff] }
 0x371   : > { %5493 = vmatmul.mubr.msk.bf16.vlgmr.msra.gmra.mrb[32].mxu1 %vm2387_vm4, %v2374_v13 }
 0x372   : > { %5497 = vmatpush3.bf16.msra.mxu1 %v5982_v14  ;;  %5504 = vmatprep.mubr.msk.bf16.mxu1 %vm6138_vm1, %v6137_v8 }
 0x373   : > { %5498 = vmatprep.subr.bf16.mxu1 %v6137_v8  ;;  %4153 = vperm.xlu1 %5819, %v4150_v12  }
 0x376   : > { %5499 = vmatpush3.bf16.msra.mxu1 %v5984_v15 }
 0x377   : > { %5500 = vmatprep.subr.bf16.mxu1 %v6137_v8  ;;  %4218 = vperm.xlu1 %5819, %v4210_v33  }
 0x37a   : > { %5501 = vmatpush3.bf16.msra.mxu1 %v5986_v16 }
 0x37b   : > { %5502 = vmatprep.subr.bf16.mxu1 %v6137_v8 }
 0x37e   : > { %5503 = vmatpush3.bf16.msra.mxu1 %v5988_v17 }
 0x37f   : > { %5520 = vmatprep.subr.bf16.mxu1 %v6137_v8 }
 0x444   : > { %v2425_v20 = vpop.f32.mrb[32].mxu1 }
 0x445   : > { %v2426_v21 = vadd.f32 %v2425_v20, %v2385_v19  ;;  %v5494_v22 = vpop.f32.mrb[33].mxu1 }
 0x446   : > { %v2428_v23 = vpop.f32.mrb[34].mxu1 }
 0x447   : > { %v2431_v24 = vmax.f32 %v2426_v21, 0.0  ;;  %v5495_v25 = vpop.f32.mrb[35].mxu1 }
 0x449   : > { %v2432_v28 = vpack.c.bf16 %v2431_v24, %v2431_v24 }
 0x44b   : > { %5505 = vmatmul.mubr.msk.bf16.vlgmr.msra.gmra.mrb[36].mxu1 %vm643_vm0, %v2432_v28  ;;  %5517 = vmatmul.mubr.msk.bf16.vlgmr.msra.gmra.mrb[24].mxu0 %vm643_vm0, %v2432_v28 }
 0x44c   : > { %5521 = vmatpush3.bf16.msra.mxu1 %v5990_v26  ;;  %5533 = vmatpush3.bf16.msra.mxu0 %v5991_v27 }
 0x44d   : > { %5522 = vmatprep.subr.bf16.mxu1 %v6137_v8  ;;  %5534 = vmatprep.subr.bf16.mxu0 %v6137_v8 }
 0x44e   : > { %5528 = vmatprep.mubr.msk.bf16.mxu1 %vm6138_vm1, %v6137_v8  ;;  %5540 = vmatprep.mubr.msk.bf16.mxu0 %vm6138_vm1, %v6137_v8 }
 0x450   : > { %5523 = vmatpush3.bf16.msra.mxu1 %v5992_v29  ;;  %5535 = vmatpush3.bf16.msra.mxu0 %v5993_v30 }
 0x451   : > { %5524 = vmatprep.subr.bf16.mxu1 %v6137_v8  ;;  %5536 = vmatprep.subr.bf16.mxu0 %v6137_v8 }
 0x454   : > { %5525 = vmatpush3.bf16.msra.mxu1 %v5994_v31  ;;  %5537 = vmatpush3.bf16.msra.mxu0 %v5995_v32 }
 0x455   : > { %5526 = vmatprep.subr.bf16.mxu1 %v6137_v8  ;;  %5538 = vmatprep.subr.bf16.mxu0 %v6137_v8 }
 0x458   : > { %5527 = vmatpush3.bf16.msra.mxu1 %v5996_v35  ;;  %5539 = vmatpush3.bf16.msra.mxu0 %v5997_v34 }
 0x459   : > { %5552 = vmatprep.subr.bf16.mxu0 %v6137_v8  ;;  %5544 = vmatprep.subr.bf16.mxu1 %v6137_v8 }
 0x45b   : > { %5529 = vmatmul.mubr.msk.bf16.vlgmr.msra.gmra.mrb[40].mxu1 %vm643_vm0, %v2432_v28  ;;  %5541 = vmatmul.mubr.msk.bf16.vlgmr.msra.gmra.mrb[28].mxu0 %vm643_vm0, %v2432_v28 }
 0x45c   : > { %5553 = vmatpush3.bf16.msra.mxu0 %v5998_v37  ;;  %5560 = vmatprep.mubr.msk.bf16.mxu0 %vm6138_vm1, %v6137_v8  ;;  %v2735_v37 = vld [vmem:[%s7413_s8] sm:$0xf] }
 0x45d   : > { %5554 = vmatprep.subr.bf16.mxu0 %v6137_v8  ;;  %5548 = vmatprep.mubr.msk.bf16.mxu1 %vm6138_vm1, %v6137_v8 }
 0x460   : > { %5555 = vmatpush3.bf16.msra.mxu0 %v5999_v38 }
 0x461   : > { %5556 = vmatprep.subr.bf16.mxu0 %v6137_v8 }
 0x464   : > { %5557 = vmatpush3.bf16.msra.mxu0 %v6000_v39 }
 0x465   : > { %5558 = vmatprep.subr.bf16.mxu0 %v6137_v8 }
 0x468   : > { %5559 = vmatpush3.bf16.msra.mxu0 %v6001_v40 }
 0x469   : > { %5576 = vmatprep.subr.bf16.mxu0 %v6137_v8 }
 0x46b   : > { %5561 = vmatmul.mubr.msk.bf16.vlgmr.msra.gmra.mrb[32].mxu0 %vm643_vm0, %v6948_v42 }
 0x46c   : > { %5577 = vmatpush3.bf16.msra.mxu0 %v6002_v41  ;;  %5584 = vmatprep.mubr.msk.bf16.mxu0 %vm6138_vm1, %v6137_v8 }
 0x46d   : > { %5578 = vmatprep.subr.bf16.mxu0 %v6137_v8 }
 0x470   : > { %5579 = vmatpush3.bf16.msra.mxu0 %v6003_v43  ;;  %v6035_v43 = vld [vmem:[%s7408_s3 + $0x8] sm:$0xff]  }
 0x471   : > { %5580 = vmatprep.subr.bf16.mxu0 %v6137_v8 }
 0x474   : > { %5581 = vmatpush3.bf16.msra.mxu0 %v6004_v44  ;;  %v6036_v44 = vld [vmem:[%s7408_s3 + $0x10] sm:$0xff]  }
 0x475   : > { %5582 = vmatprep.subr.bf16.mxu0 %v6137_v8 }
 0x478   : > { %5583 = vmatpush3.bf16.msra.mxu0 %v6005_v45 }
 0x479   : > { %5600 = vmatprep.subr.bf16.mxu0 %v6137_v8 }
 0x47b   : > { %5585 = vmatmul.mubr.msk.bf16.vlgmr.msra.gmra.mrb[36].mxu0 %vm643_vm0, %v6948_v42 }
 0x47c   : > { %5601 = vmatpush3.bf16.msra.mxu0 %v6006_v46  ;;  %5608 = vmatprep.mubr.msk.bf16.mxu0 %vm6138_vm1, %v6137_v8 }
 0x47d   : > { %5602 = vmatprep.subr.bf16.mxu0 %v6137_v8 }
 0x480   : > { %5603 = vmatpush3.bf16.msra.mxu0 %v6007_v47 }
 0x481   : > { %5604 = vmatprep.subr.bf16.mxu0 %v6137_v8 }
 0x484   : > { %5605 = vmatpush3.bf16.msra.mxu0 %v6008_v48 }
 0x485   : > { %5606 = vmatprep.subr.bf16.mxu0 %v6137_v8 }
 0x488   : > { %5607 = vmatpush3.bf16.msra.mxu0 %v6009_v49 }
 0x489   : > { %5624 = vmatprep.subr.bf16.mxu0 %v6137_v8 }
 0x48b   : > { %5609 = vmatmul.mubr.msk.bf16.vlgmr.msra.gmra.mrb[40].mxu0 %vm643_vm0, %v6948_v42 }
 0x48c   : > { %5625 = vmatpush3.bf16.msra.mxu0 %v6010_v50  ;;  %5632 = vmatprep.mubr.msk.bf16.mxu0 %vm6138_vm1, %v6137_v8 }
 0x48d   : > { %5626 = vmatprep.subr.bf16.mxu0 %v6137_v8 }
 0x490   : > { %5627 = vmatpush3.bf16.msra.mxu0 %v6011_v51 }
 0x491   : > { %5628 = vmatprep.subr.bf16.mxu0 %v6137_v8 }
 0x494   : > { %5629 = vmatpush3.bf16.msra.mxu0 %v6012_v52 }
 0x495   : > { %5630 = vmatprep.subr.bf16.mxu0 %v6137_v8 }
 0x498   : > { %5631 = vmatpush3.bf16.msra.mxu0 %v6013_v53 }
 0x499   : > { %5648 = vmatprep.subr.bf16.mxu0 %v6137_v8 }
 0x49b   : > { %5633 = vmatmul.mubr.msk.bf16.vlgmr.msra.gmra.mrb[44].mxu0 %vm643_vm0, %v6948_v42 }
 0x49c   : > { %5649 = vmatpush3.bf16.msra.mxu0 %v6014_v54  ;;  %5656 = vmatprep.mubr.msk.bf16.mxu0 %vm6138_vm1, %v6137_v8 }
 0x49d   : > { %5650 = vmatprep.subr.bf16.mxu0 %v6137_v8 }
 0x4a0   : > { %5651 = vmatpush3.bf16.msra.mxu0 %v6015_v55 }
 0x4a1   : > { %5652 = vmatprep.subr.bf16.mxu0 %v6137_v8 }
 0x4a4   : > { %5653 = vmatpush3.bf16.msra.mxu0 %v6016_v56 }
 0x4a5   : > { %5654 = vmatprep.subr.bf16.mxu0 %v6137_v8 }
 0x4a8   : > { %5655 = vmatpush3.bf16.msra.mxu0 %v6017_v57 }
 0x4a9   : > { %5672 = vmatprep.subr.bf16.mxu0 %v6137_v8 }
 0x4ab   : > { %5657 = vmatmul.mubr.msk.bf16.vlgmr.msra.gmra.mrb[48].mxu0 %vm643_vm0, %v6948_v42 }
 0x4ac   : > { %5673 = vmatpush3.bf16.msra.mxu0 %v6018_v58  ;;  %5680 = vmatprep.mubr.msk.bf16.mxu0 %vm6138_vm1, %v6137_v8 }
 0x4ad   : > { %5674 = vmatprep.subr.bf16.mxu0 %v6137_v8 }
 0x4b0   : > { %5675 = vmatpush3.bf16.msra.mxu0 %v6019_v59 }
 0x4b1   : > { %5676 = vmatprep.subr.bf16.mxu0 %v6137_v8 }
 0x4b4   : > { %5677 = vmatpush3.bf16.msra.mxu0 %v6020_v60 }
 0x4b5   : > { %5678 = vmatprep.subr.bf16.mxu0 %v6137_v8 }
 0x4b8   : > { %5679 = vmatpush3.bf16.msra.mxu0 %v6021_v61 }
 0x4b9   : > { %5696 = vmatprep.subr.bf16.mxu0 %v6137_v8 }
 0x4bb   : > { %5681 = vmatmul.mubr.msk.bf16.vlgmr.msra.gmra.mrb[52].mxu0 %vm643_vm0, %v6948_v42 }
 0x4bc   : > { %5697 = vmatpush3.bf16.msra.mxu0 %v6022_v62  ;;  %5704 = vmatprep.mubr.msk.bf16.mxu0 %vm6138_vm1, %v6137_v8 }
 0x4bd   : > { %5698 = vmatprep.subr.bf16.mxu0 %v6137_v8 }
 0x4c0   : > { %5699 = vmatpush3.bf16.msra.mxu0 %v6023_v63 }
 0x4c1   : > { %5700 = vmatprep.subr.bf16.mxu0 %v6137_v8 }
 0x4c4   : > { %5701 = vmatpush3.bf16.msra.mxu0 %v6024_v0  ;;  %v6037_v0 = vld [vmem:[%s7408_s3 + $0x18] sm:$0xff]  }
 0x4c5   : > { %5702 = vmatprep.subr.bf16.mxu0 %v6137_v8 }
 0x4c8   : > { %5703 = vmatpush3.bf16.msra.mxu0 %v6025_v1 }
 0x4c9   : > { %5720 = vmatprep.subr.bf16.mxu0 %v6137_v8 }
 0x4cb   : > { %5705 = vmatmul.mubr.msk.bf16.vlgmr.msra.gmra.mrb[56].mxu0 %vm643_vm0, %v6948_v42 }
 0x4cc   : > { %5721 = vmatpush3.bf16.msra.mxu0 %v6026_v2  ;;  %5728 = vmatprep.mubr.msk.bf16.mxu0 %vm6138_vm1, %v6137_v8 }
 0x4cd   : > { %5722 = vmatprep.subr.bf16.mxu0 %v6137_v8 }
 0x4d0   : > { %5723 = vmatpush3.bf16.msra.mxu0 %v6027_v3 }
 0x4d1   : > { %5724 = vmatprep.subr.bf16.mxu0 %v6137_v8 }
 0x4d4   : > { %5725 = vmatpush3.bf16.msra.mxu0 %v6028_v4 }
 0x4d5   : > { %5726 = vmatprep.subr.bf16.mxu0 %v6137_v8 }
 0x4d8   : > { %5727 = vmatpush3.bf16.msra.mxu0 %v6029_v5 }
 0x4d9   : > { %5744 = vmatprep.subr.bf16.mxu0 %v6137_v8 }
 0x4db   : > { %5729 = vmatmul.mubr.msk.bf16.vlgmr.msra.gmra.mrb[60].mxu0 %vm643_vm0, %v6948_v42 }
 0x4dc   : > { %5745 = vmatpush3.bf16.msra.mxu0 %v6030_v6  ;;  %5752 = vmatprep.mubr.msk.bf16.mxu0 %vm6138_vm1, %v6137_v8 }
 0x4dd   : > { %5746 = vmatprep.subr.bf16.mxu0 %v6137_v8 }
 0x4e0   : > { %5747 = vmatpush3.bf16.msra.mxu0 %v6031_v7 }
 0x4e1   : > { %5748 = vmatprep.subr.bf16.mxu0 %v6137_v8 }
 0x4e4   : > { %5749 = vmatpush3.bf16.msra.mxu0 %v6032_v9 }
 0x4e5   : > { %5750 = vmatprep.subr.bf16.mxu0 %v6137_v8 }
 0x4e8   : > { %5751 = vmatpush3.bf16.msra.mxu0 %v6033_v10 }
 0x4e9   : > { %4165 = vmatprep.subr.bf16.mxu0 %v6139_v36 }
 0x4eb   : > { %5753 = vmatmul.mubr.msk.bf16.vlgmr.msra.gmra.mrb[64].mxu0 %vm643_vm0, %v6948_v42  ;;  %v6034_v42 = vld [vmem:[%s7408_s3] sm:$0xff]  }
 0x51e   : > { %v2509_v13 = vpop.f32.mrb[36].mxu1  ;;  %v2582_v14 = vpop.f32.mrb[24].mxu0 }
 0x51f   : > { %2515 = vst.msk [vmem:[#allocation4] sm:$0xff] %vm643_vm0, %v2509_v13  ;;  %2588 = vst.msk [vmem:[#allocation4 + $0x8] sm:$0xff] %vm643_vm0, %v2582_v14  ;;  %v5506_v15 = vpop.f32.mrb[37].mxu1  ;;  %v5518_v16 = vpop.f32.mrb[25].mxu0 }
 0x520   : > { %v2512_v17 = vpop.f32.mrb[38].mxu1  ;;  %v2585_v18 = vpop.f32.mrb[26].mxu0 }
 0x521   : > { %v5507_v19 = vpop.f32.mrb[39].mxu1  ;;  %v5519_v20 = vpop.f32.mrb[27].mxu0 }
 0x522   : > { %v2746_v14 = vpop.permute.xlu1 %2745 }
 0x526   : > { %v2736_v21 = vld [vmem:[#allocation4] sm:$0xff]  ;;  %v2737_v22 = vld [vmem:[#allocation4 + $0x8] sm:$0xff] }
 0x527   : > { %v2740_v23 = vpack.c.bf16 %v2737_v22, %v2736_v21  ;;  %v6038_v21 = vld [vmem:[%s7408_s3 + $0x20] sm:$0xff]  }
 0x529   : > { %5545 = vmatpush3.bf16.msra.mxu1 %v2740_v23  ;;  %v6039_v23 = vld [vmem:[%s7408_s3 + $0x28] sm:$0xff]  }
 0x52a   : > { %5546 = vmatprep.subr.bf16.mxu1 %v6137_v8 }
 0x52e   : > { %v2655_v24 = vpop.f32.mrb[40].mxu1  ;;  %v2728_v25 = vpop.f32.mrb[28].mxu0 }
 0x52f   : > { %2661 = vst.msk [vmem:[#allocation4 + $0x10] sm:$0xff] %vm643_vm0, %v2655_v24  ;;  %2734 = vst.msk [vmem:[#allocation4 + $0x18] sm:$0xff] %vm643_vm0, %v2728_v25  ;;  %v5530_v26 = vpop.f32.mrb[41].mxu1  ;;  %v5542_v27 = vpop.f32.mrb[29].mxu0  ;;  %v6040_v24 = vld [vmem:[%s7408_s3 + $0x30] sm:$0xff]   ;;  %v6041_v25 = vld [vmem:[%s7408_s3 + $0x38] sm:$0xff]  }
 0x530   : > { %v2658_v28 = vpop.f32.mrb[42].mxu1  ;;  %v2731_v29 = vpop.f32.mrb[30].mxu0  ;;  %v6042_v26 = vld [vmem:[%s7408_s3 + $0x40] sm:$0xff]   ;;  %v6043_v27 = vld [vmem:[%s7408_s3 + $0x48] sm:$0xff]  }
 0x531   : > { %v5531_v30 = vpop.f32.mrb[43].mxu1  ;;  %v5543_v31 = vpop.f32.mrb[31].mxu0  ;;  %v6044_v28 = vld [vmem:[%s7408_s3 + $0x50] sm:$0xff]   ;;  %v6045_v29 = vld [vmem:[%s7408_s3 + $0x58] sm:$0xff]  }
 0x532   : > { %v6046_v30 = vld [vmem:[%s7408_s3 + $0x60] sm:$0xff]   ;;  %v6047_v31 = vld [vmem:[%s7408_s3 + $0x68] sm:$0xff]  }
 0x536   : > { %v2738_v32 = vld [vmem:[#allocation4 + $0x10] sm:$0xff]  ;;  %v2739_v35 = vld [vmem:[#allocation4 + $0x18] sm:$0xff] }
 0x537   : > { %v2741_v34 = vpack.c.bf16 %v2739_v35, %v2738_v32  ;;  %v6048_v32 = vld [vmem:[%s7408_s3 + $0x70] sm:$0xff]   ;;  %v6049_v35 = vld [vmem:[%s7408_s3 + $0x78] sm:$0xff]  }
 0x539   : > { %5547 = vmatpush3.bf16.msra.mxu1 %v2741_v34  ;;  %v6050_v34 = vld [vmem:[%s7408_s3 + $0x80] sm:$0xff]  }
 0x53a   : > { %5564 = vmatprep.subr.bf16.mxu1 %v6137_v8 }
 0x53c   : > { %5549 = vmatmul.mubr.msk.bf16.vlgmr.msra.gmra.mrb[44].mxu1 %vm2387_vm4, %v2735_v37  ;;  %v6051_v37 = vld [vmem:[%s7408_s3 + $0x88] sm:$0xff]  }
 0x53d   : > { %5572 = vmatprep.mubr.msk.bf16.mxu1 %vm6138_vm1, %v6137_v8  ;;  %5565 = vmatpush3.bf16.msra.mxu1 %v6034_v42  ;;  %v6056_v42 = vld [vmem:[%s7408_s3 + $0xb0] sm:$0xff]  }
 0x53e   : > { %v2862_v38 = vpop.f32.mrb[32].mxu0  ;;  %5566 = vmatprep.subr.bf16.mxu1 %v6137_v8 }
 0x53f   : > { %2869 = vst.msk [vmem:[#allocation5] sm:$0xff] %vm2868_vm5, %v2862_v38  ;;  %v5562_v39 = vpop.f32.mrb[33].mxu0  ;;  %v6052_v38 = vld [vmem:[%s7408_s3 + $0x90] sm:$0xff]  }
 0x540   : > { %v2865_v40 = vpop.f32.mrb[34].mxu0  ;;  %v6053_v39 = vld [vmem:[%s7408_s3 + $0x98] sm:$0xff]  }
 0x541   : > { %v5563_v41 = vpop.f32.mrb[35].mxu0  ;;  %5567 = vmatpush3.bf16.msra.mxu1 %v6035_v43  ;;  %v6054_v40 = vld [vmem:[%s7408_s3 + $0xa0] sm:$0xff]   ;;  %v6057_v43 = vld [vmem:[%s7408_s3 + $0xb8] sm:$0xff]  }
 0x542   : > { %5568 = vmatprep.subr.bf16.mxu1 %v6137_v8  ;;  %v6055_v41 = vld [vmem:[%s7408_s3 + $0xa8] sm:$0xff]  }
 0x545   : > { %5569 = vmatpush3.bf16.msra.mxu1 %v6036_v44  ;;  %v6058_v44 = vld [vmem:[%s7408_s3 + $0xc0] sm:$0xff]  }
 0x546   : > { %5570 = vmatprep.subr.bf16.mxu1 %v6137_v8 }
 0x549   : > { %5571 = vmatpush3.bf16.msra.mxu1 %v6037_v0 }
 0x54a   : > { %5588 = vmatprep.subr.bf16.mxu1 %v6137_v8 }
 0x54e   : > { %v3013_v45 = vpop.f32.mrb[36].mxu0 }
 0x54f   : > { %3019 = vst.msk [vmem:[#allocation5 + $0x10] sm:$0xff] %vm2868_vm5, %v3013_v45  ;;  %v5586_v46 = vpop.f32.mrb[37].mxu0  ;;  %v6059_v45 = vld [vmem:[%s7408_s3 + $0xc8] sm:$0xff]  }
 0x550   : > { %v3016_v47 = vpop.f32.mrb[38].mxu0  ;;  %v6060_v46 = vld [vmem:[%s7408_s3 + $0xd0] sm:$0xff]  }
 0x551   : > { %v5587_v48 = vpop.f32.mrb[39].mxu0  ;;  %v6061_v47 = vld [vmem:[%s7408_s3 + $0xd8] sm:$0xff]  }
 0x552   : > { %v6062_v48 = vld [vmem:[%s7408_s3 + $0xe0] sm:$0xff]  }
 0x55e   : > { %v3160_v49 = vpop.f32.mrb[40].mxu0 }
 0x55f   : > { %3166 = vst.msk [vmem:[#allocation5 + $0x20] sm:$0xff] %vm2868_vm5, %v3160_v49  ;;  %v5610_v50 = vpop.f32.mrb[41].mxu0  ;;  %v6063_v49 = vld [vmem:[%s7408_s3 + $0xe8] sm:$0xff]  }
 0x560   : > { %v3163_v51 = vpop.f32.mrb[42].mxu0  ;;  %v6064_v50 = vld [vmem:[%s7408_s3 + $0xf0] sm:$0xff]  }
 0x561   : > { %v5611_v52 = vpop.f32.mrb[43].mxu0  ;;  %v6065_v51 = vld [vmem:[%s7408_s3 + $0xf8] sm:$0xff]  }
 0x562   : > { %v6066_v52 = vld [vmem:[%s7408_s3 + $0x100] sm:$0xff]  }
 0x56e   : > { %v3307_v53 = vpop.f32.mrb[44].mxu0 }
 0x56f   : > { %3313 = vst.msk [vmem:[#allocation5 + $0x30] sm:$0xff] %vm2868_vm5, %v3307_v53  ;;  %v5634_v54 = vpop.f32.mrb[45].mxu0  ;;  %v6067_v53 = vld [vmem:[%s7408_s3 + $0x108] sm:$0xff]  }
 0x570   : > { %v3310_v55 = vpop.f32.mrb[46].mxu0  ;;  %v6068_v54 = vld [vmem:[%s7408_s3 + $0x110] sm:$0xff]  }
 0x571   : > { %v5635_v56 = vpop.f32.mrb[47].mxu0  ;;  %v6069_v55 = vld [vmem:[%s7408_s3 + $0x118] sm:$0xff]  }
 0x57e   : > { %v3454_v57 = vpop.f32.mrb[48].mxu0 }
 0x57f   : > { %3460 = vst.msk [vmem:[#allocation5 + $0x40] sm:$0xff] %vm2868_vm5, %v3454_v57  ;;  %v5658_v58 = vpop.f32.mrb[49].mxu0 }
 0x580   : > { %v3457_v59 = vpop.f32.mrb[50].mxu0 }
 0x581   : > { %v5659_v60 = vpop.f32.mrb[51].mxu0 }
 0x582   : > { %v4123_v60 = vld [vmem:[#allocation5] sm:$0xff] }
 0x58e   : > { %v3601_v61 = vpop.f32.mrb[52].mxu0 }
 0x58f   : > { %3607 = vst.msk [vmem:[#allocation5 + $0x50] sm:$0xff] %vm2868_vm5, %v3601_v61  ;;  %v5682_v62 = vpop.f32.mrb[53].mxu0 }
 0x590   : > { %v3604_v63 = vpop.f32.mrb[54].mxu0 }
 0x591   : > { %v5683_v1 = vpop.f32.mrb[55].mxu0  ;;  %v7326_v63 = vld [vmem:[%s7415_s10] sm:$0xff] }
 0x592   : > { %v5073_v0 = vcombine.high %v7326_v63, %v7326_v63 }
 0x594   : > { %5074 = vmatprep.mubr.msk.bf16.mxu0 %vm2868_vm5, %v5073_v0 }
 0x59e   : > { %v3748_v2 = vpop.f32.mrb[56].mxu0 }
 0x59f   : > { %3754 = vst.msk [vmem:[#allocation5 + $0x60] sm:$0xff] %vm2868_vm5, %v3748_v2  ;;  %v5706_v3 = vpop.f32.mrb[57].mxu0 }
 0x5a0   : > { %v3751_v4 = vpop.f32.mrb[58].mxu0 }
 0x5a1   : > { %v5707_v5 = vpop.f32.mrb[59].mxu0  ;;  %v4125_v4 = vld [vmem:[#allocation5 + $0x10] sm:$0xff] }
 0x5ae   : > { %v3895_v6 = vpop.f32.mrb[60].mxu0 }
 0x5af   : > { %3901 = vst.msk [vmem:[#allocation5 + $0x70] sm:$0xff] %vm2868_vm5, %v3895_v6  ;;  %v5730_v7 = vpop.f32.mrb[61].mxu0 }
 0x5b0   : > { %v3898_v9 = vpop.f32.mrb[62].mxu0 }
 0x5b1   : > { %v5731_v10 = vpop.f32.mrb[63].mxu0 }
 0x5be   : > { %v4042_v11 = vpop.f32.mrb[64].mxu0 }
 0x5bf   : > { %4048 = vst.msk [vmem:[#allocation5 + $0x80] sm:$0xff] %vm2868_vm5, %v4042_v11  ;;  %v5754_v12 = vpop.f32.mrb[65].mxu0 }
 0x5c0   : > { %v4045_v33 = vpop.f32.mrb[66].mxu0  ;;  %v4127_v12 = vld [vmem:[#allocation5 + $0x20] sm:$0xff] }
 0x5c1   : > { %v5755_v13 = vpop.f32.mrb[67].mxu0 }
 0x60f   : > { %v2785_v15 = vpop.f32.mrb[44].mxu1 }
 0x610   : > { %v2786_v16 = vadd.f32 %v2785_v15, %v2746_v14  ;;  %v5550_v17 = vpop.f32.mrb[45].mxu1 }
 0x611   : > { %v2788_v18 = vpop.f32.mrb[46].mxu1 }
 0x612   : > { %v2791_v19 = vmax.f32 %v2786_v16, 0.0  ;;  %v5551_v20 = vpop.f32.mrb[47].mxu1  ;;  %v4129_v18 = vld [vmem:[#allocation5 + $0x30] sm:$0xff] }
 0x614   : > { %v7159_v22 = vpack.c.bf16 %v2791_v19, %v2791_v19 }
 0x616   : > { %5573 = vmatmul.mubr.msk.bf16.vlgmr.msra.gmra.mrb[48].mxu1 %vm643_vm0, %v7159_v22 }
 0x617   : > { %5589 = vmatpush3.bf16.msra.mxu1 %v6038_v21  ;;  %5596 = vmatprep.mubr.msk.bf16.mxu1 %vm6138_vm1, %v6137_v8 }
 0x618   : > { %5590 = vmatprep.subr.bf16.mxu1 %v6137_v8 }
 0x61b   : > { %5591 = vmatpush3.bf16.msra.mxu1 %v6039_v23 }
 0x61c   : > { %5592 = vmatprep.subr.bf16.mxu1 %v6137_v8 }
 0x61f   : > { %5593 = vmatpush3.bf16.msra.mxu1 %v6040_v24 }
 0x620   : > { %5594 = vmatprep.subr.bf16.mxu1 %v6137_v8 }
 0x623   : > { %5595 = vmatpush3.bf16.msra.mxu1 %v6041_v25  ;;  %v4131_v25 = vld [vmem:[#allocation5 + $0x40] sm:$0xff] }
 0x624   : > { %5612 = vmatprep.subr.bf16.mxu1 %v6137_v8 }
 0x626   : > { %5597 = vmatmul.mubr.msk.bf16.vlgmr.msra.gmra.mrb[52].mxu1 %vm643_vm0, %v7159_v22 }
 0x627   : > { %5613 = vmatpush3.bf16.msra.mxu1 %v6042_v26  ;;  %5620 = vmatprep.mubr.msk.bf16.mxu1 %vm6138_vm1, %v6137_v8 }
 0x628   : > { %5614 = vmatprep.subr.bf16.mxu1 %v6137_v8 }
 0x62b   : > { %5615 = vmatpush3.bf16.msra.mxu1 %v6043_v27 }
 0x62c   : > { %5616 = vmatprep.subr.bf16.mxu1 %v6137_v8 }
 0x62f   : > { %5617 = vmatpush3.bf16.msra.mxu1 %v6044_v28 }
 0x630   : > { %5618 = vmatprep.subr.bf16.mxu1 %v6137_v8 }
 0x633   : > { %5619 = vmatpush3.bf16.msra.mxu1 %v6045_v29 }
 0x634   : > { %5636 = vmatprep.subr.bf16.mxu1 %v6137_v8 }
 0x636   : > { %5621 = vmatmul.mubr.msk.bf16.vlgmr.msra.gmra.mrb[56].mxu1 %vm643_vm0, %v7159_v22 }
 0x637   : > { %5637 = vmatpush3.bf16.msra.mxu1 %v6046_v30  ;;  %5644 = vmatprep.mubr.msk.bf16.mxu1 %vm6138_vm1, %v6137_v8 }
 0x638   : > { %5638 = vmatprep.subr.bf16.mxu1 %v6137_v8 }
 0x63b   : > { %5639 = vmatpush3.bf16.msra.mxu1 %v6047_v31 }
 0x63c   : > { %5640 = vmatprep.subr.bf16.mxu1 %v6137_v8 }
 0x63f   : > { %5641 = vmatpush3.bf16.msra.mxu1 %v6048_v32  ;;  %v4133_v32 = vld [vmem:[#allocation5 + $0x50] sm:$0xff] }
 0x640   : > { %5642 = vmatprep.subr.bf16.mxu1 %v6137_v8 }
 0x643   : > { %5643 = vmatpush3.bf16.msra.mxu1 %v6049_v35 }
 0x644   : > { %5660 = vmatprep.subr.bf16.mxu1 %v6137_v8 }
 0x646   : > { %5645 = vmatmul.mubr.msk.bf16.vlgmr.msra.gmra.mrb[60].mxu1 %vm643_vm0, %v7159_v22 }
 0x647   : > { %5661 = vmatpush3.bf16.msra.mxu1 %v6050_v34  ;;  %5668 = vmatprep.mubr.msk.bf16.mxu1 %vm6138_vm1, %v6137_v8 }
 0x648   : > { %5662 = vmatprep.subr.bf16.mxu1 %v6137_v8 }
 0x64b   : > { %5663 = vmatpush3.bf16.msra.mxu1 %v6051_v37 }
 0x64c   : > { %5664 = vmatprep.subr.bf16.mxu1 %v6137_v8 }
 0x64f   : > { %5665 = vmatpush3.bf16.msra.mxu1 %v6052_v38 }
 0x650   : > { %5666 = vmatprep.subr.bf16.mxu1 %v6137_v8 }
 0x653   : > { %5667 = vmatpush3.bf16.msra.mxu1 %v6053_v39 }
 0x654   : > { %5684 = vmatprep.subr.bf16.mxu1 %v6137_v8 }
 0x656   : > { %5669 = vmatmul.mubr.msk.bf16.vlgmr.msra.gmra.mrb[64].mxu1 %vm643_vm0, %v7159_v22 }
 0x657   : > { %5685 = vmatpush3.bf16.msra.mxu1 %v6054_v40  ;;  %5692 = vmatprep.mubr.msk.bf16.mxu1 %vm6138_vm1, %v6137_v8 }
 0x658   : > { %5686 = vmatprep.subr.bf16.mxu1 %v6137_v8 }
 0x65b   : > { %5687 = vmatpush3.bf16.msra.mxu1 %v6055_v41  ;;  %v4135_v41 = vld [vmem:[#allocation5 + $0x60] sm:$0xff] }
 0x65c   : > { %5688 = vmatprep.subr.bf16.mxu1 %v6137_v8 }
 0x65f   : > { %5689 = vmatpush3.bf16.msra.mxu1 %v6056_v42 }
 0x660   : > { %5690 = vmatprep.subr.bf16.mxu1 %v6137_v8 }
 0x663   : > { %5691 = vmatpush3.bf16.msra.mxu1 %v6057_v43 }
 0x664   : > { %5708 = vmatprep.subr.bf16.mxu1 %v6137_v8 }
 0x666   : > { %5693 = vmatmul.mubr.msk.bf16.vlgmr.msra.gmra.mrb[68].mxu1 %vm643_vm0, %v7159_v22 }
 0x667   : > { %5709 = vmatpush3.bf16.msra.mxu1 %v6058_v44  ;;  %5716 = vmatprep.mubr.msk.bf16.mxu1 %vm6138_vm1, %v6137_v8 }
 0x668   : > { %5710 = vmatprep.subr.bf16.mxu1 %v6137_v8 }
 0x66b   : > { %5711 = vmatpush3.bf16.msra.mxu1 %v6059_v45 }
 0x66c   : > { %5712 = vmatprep.subr.bf16.mxu1 %v6137_v8 }
 0x66f   : > { %5713 = vmatpush3.bf16.msra.mxu1 %v6060_v46 }
 0x670   : > { %5714 = vmatprep.subr.bf16.mxu1 %v6137_v8 }
 0x673   : > { %5715 = vmatpush3.bf16.msra.mxu1 %v6061_v47 }
 0x674   : > { %5732 = vmatprep.subr.bf16.mxu1 %v6137_v8 }
 0x676   : > { %5717 = vmatmul.mubr.msk.bf16.vlgmr.msra.gmra.mrb[72].mxu1 %vm643_vm0, %v7159_v22 }
 0x677   : > { %5733 = vmatpush3.bf16.msra.mxu1 %v6062_v48  ;;  %5740 = vmatprep.mubr.msk.bf16.mxu1 %vm6138_vm1, %v6137_v8  ;;  %v4137_v48 = vld [vmem:[#allocation5 + $0x70] sm:$0xff] }
 0x678   : > { %5734 = vmatprep.subr.bf16.mxu1 %v6137_v8 }
 0x67b   : > { %5735 = vmatpush3.bf16.msra.mxu1 %v6063_v49 }
 0x67c   : > { %5736 = vmatprep.subr.bf16.mxu1 %v6137_v8 }
 0x67f   : > { %5737 = vmatpush3.bf16.msra.mxu1 %v6064_v50 }
 0x680   : > { %5738 = vmatprep.subr.bf16.mxu1 %v6137_v8 }
 0x683   : > { %5739 = vmatpush3.bf16.msra.mxu1 %v6065_v51 }
 0x684   : > { %5756 = vmatprep.subr.bf16.mxu1 %v6137_v8 }
 0x686   : > { %5741 = vmatmul.mubr.msk.bf16.vlgmr.msra.gmra.mrb[76].mxu1 %vm643_vm0, %v7159_v22 }
 0x687   : > { %5757 = vmatpush3.bf16.msra.mxu1 %v6066_v52  ;;  %5764 = vmatprep.mubr.msk.bf16.mxu1 %vm6138_vm1, %v6137_v8 }
 0x688   : > { %5758 = vmatprep.subr.bf16.mxu1 %v6137_v8 }
 0x68b   : > { %5759 = vmatpush3.bf16.msra.mxu1 %v6067_v53 }
 0x68c   : > { %5760 = vmatprep.subr.bf16.mxu1 %v6137_v8 }
 0x68f   : > { %5761 = vmatpush3.bf16.msra.mxu1 %v6068_v54 }
 0x690   : > { %5762 = vmatprep.subr.bf16.mxu1 %v6137_v8 }
 0x693   : > { %5763 = vmatpush3.bf16.msra.mxu1 %v6069_v55  ;;  %v4139_v55 = vld [vmem:[#allocation5 + $0x80] sm:$0xff] }
 0x694   : > { %5768 = vmatprep.subr.bf16.mxu1 %v6137_v8 }
 0x696   : > { %5765 = vmatmul.mubr.msk.bf16.vlgmr.msra.gmra.mrb[80].mxu1 %vm643_vm0, %v7159_v22 }
 0x697   : > { %5770 = vmatprep.mubr.msk.bf16.mxu1 %vm6138_vm1, %v6137_v8 }
 0x6e9   : > { %v2939_v56 = vpop.f32.mrb[48].mxu1 }
 0x6ea   : > { %2945 = vst.msk [vmem:[#allocation5 + $0x8] sm:$0xff] %vm2868_vm5, %v2939_v56  ;;  %v5574_v57 = vpop.f32.mrb[49].mxu1 }
 0x6eb   : > { %v2942_v58 = vpop.f32.mrb[50].mxu1 }
 0x6ec   : > { %v5575_v59 = vpop.f32.mrb[51].mxu1  ;;  %v5072_v58 = vcombine.low %v7326_v63, %v7326_v63  ;;  %v4214_v63 = vpop.permute.xlu0 %4213 }
 0x6ed   : > { %v4154_v59 = vpop.permute.xlu1 %4153 }
 0x6f1   : > { %v4124_v61 = vld [vmem:[#allocation5 + $0x8] sm:$0xff] }
 0x6f2   : > { %v4141_v62 = vpack.c.bf16 %v4124_v61, %v4123_v60 }
 0x6f4   : > { %4166 = vmatpush1.bf16.msra.mxu0 %v4141_v62 }
 0x6f5   : > { %4167 = vmatprep.subr.bf16.mxu0 %v6139_v36 }
 0x6f9   : > { %v3086_v8 = vpop.f32.mrb[52].mxu1 }
 0x6fa   : > { %3092 = vst.msk [vmem:[#allocation5 + $0x18] sm:$0xff] %vm2868_vm5, %v3086_v8  ;;  %v5598_v1 = vpop.f32.mrb[53].mxu1 }
 0x6fb   : > { %v3089_v2 = vpop.f32.mrb[54].mxu1 }
 0x6fc   : > { %v5599_v3 = vpop.f32.mrb[55].mxu1 }
 0x6fd   : > { %v6072_v3 = vld [vmem:[%s7417_s12] sm:$0xff]  }
 0x701   : > { %v4126_v5 = vld [vmem:[#allocation5 + $0x18] sm:$0xff] }
 0x702   : > { %v4142_v6 = vpack.c.bf16 %v4126_v5, %v4125_v4 }
 0x704   : > { %4168 = vmatpush1.bf16.msra.mxu0 %v4142_v6 }
 0x705   : > { %4169 = vmatprep.subr.bf16.mxu0 %v6139_v36 }
 0x709   : > { %v3233_v7 = vpop.f32.mrb[56].mxu1 }
 0x70a   : > { %3239 = vst.msk [vmem:[#allocation5 + $0x28] sm:$0xff] %vm2868_vm5, %v3233_v7  ;;  %v5622_v9 = vpop.f32.mrb[57].mxu1  ;;  %v4219_v7 = vpop.permute.xlu1 %4218 }
 0x70b   : > { %v3236_v10 = vpop.f32.mrb[58].mxu1 }
 0x70c   : > { %v5623_v11 = vpop.f32.mrb[59].mxu1 }
 0x711   : > { %v4128_v33 = vld [vmem:[#allocation5 + $0x28] sm:$0xff] }
 0x712   : > { %v4143_v13 = vpack.c.bf16 %v4128_v33, %v4127_v12 }
 0x714   : > { %4170 = vmatpush1.bf16.msra.mxu0 %v4143_v13 }
 0x715   : > { %4171 = vmatprep.subr.bf16.mxu0 %v6139_v36 }
 0x719   : > { %v3380_v14 = vpop.f32.mrb[60].mxu1 }
 0x71a   : > { %3386 = vst.msk [vmem:[#allocation5 + $0x38] sm:$0xff] %vm2868_vm5, %v3380_v14  ;;  %v5646_v15 = vpop.f32.mrb[61].mxu1 }
 0x71b   : > { %v3383_v16 = vpop.f32.mrb[62].mxu1 }
 0x71c   : > { %v5647_v17 = vpop.f32.mrb[63].mxu1 }
 0x721   : > { %v4130_v19 = vld [vmem:[#allocation5 + $0x38] sm:$0xff] }
 0x722   : > { %v4144_v20 = vpack.c.bf16 %v4130_v19, %v4129_v18 }
 0x724   : > { %4172 = vmatpush1.bf16.msra.mxu0 %v4144_v20 }
 0x725   : > { %4173 = vmatprep.subr.bf16.mxu0 %v6139_v36 }
 0x729   : > { %v3527_v21 = vpop.f32.mrb[64].mxu1 }
 0x72a   : > { %3533 = vst.msk [vmem:[#allocation5 + $0x48] sm:$0xff] %vm2868_vm5, %v3527_v21  ;;  %v5670_v22 = vpop.f32.mrb[65].mxu1 }
 0x72b   : > { %v3530_v23 = vpop.f32.mrb[66].mxu1 }
 0x72c   : > { %v5671_v24 = vpop.f32.mrb[67].mxu1 }
 0x731   : > { %v4132_v26 = vld [vmem:[#allocation5 + $0x48] sm:$0xff] }
 0x732   : > { %v4145_v27 = vpack.c.bf16 %v4132_v26, %v4131_v25 }
 0x734   : > { %4174 = vmatpush1.bf16.msra.mxu0 %v4145_v27 }
 0x735   : > { %4175 = vmatprep.subr.bf16.mxu0 %v6139_v36 }
 0x739   : > { %v3674_v28 = vpop.f32.mrb[68].mxu1 }
 0x73a   : > { %3680 = vst.msk [vmem:[#allocation5 + $0x58] sm:$0xff] %vm2868_vm5, %v3674_v28  ;;  %v5694_v29 = vpop.f32.mrb[69].mxu1 }
 0x73b   : > { %v3677_v30 = vpop.f32.mrb[70].mxu1 }
 0x73c   : > { %v5695_v31 = vpop.f32.mrb[71].mxu1 }
 0x741   : > { %v4134_v35 = vld [vmem:[#allocation5 + $0x58] sm:$0xff] }
 0x742   : > { %v4146_v34 = vpack.c.bf16 %v4134_v35, %v4133_v32 }
 0x744   : > { %4176 = vmatpush1.bf16.msra.mxu0 %v4146_v34 }
 0x745   : > { %4177 = vmatprep.subr.bf16.mxu0 %v6139_v36 }
 0x749   : > { %v3821_v37 = vpop.f32.mrb[72].mxu1 }
 0x74a   : > { %3827 = vst.msk [vmem:[#allocation5 + $0x68] sm:$0xff] %vm2868_vm5, %v3821_v37  ;;  %v5718_v38 = vpop.f32.mrb[73].mxu1 }
 0x74b   : > { %v3824_v39 = vpop.f32.mrb[74].mxu1 }
 0x74c   : > { %v5719_v40 = vpop.f32.mrb[75].mxu1 }
 0x751   : > { %v4136_v42 = vld [vmem:[#allocation5 + $0x68] sm:$0xff] }
 0x752   : > { %v4147_v43 = vpack.c.bf16 %v4136_v42, %v4135_v41 }
 0x754   : > { %4178 = vmatpush1.bf16.msra.mxu0 %v4147_v43 }
 0x755   : > { %4179 = vmatprep.subr.bf16.mxu0 %v6139_v36 }
 0x759   : > { %v3968_v44 = vpop.f32.mrb[76].mxu1 }
 0x75a   : > { %3974 = vst.msk [vmem:[#allocation5 + $0x78] sm:$0xff] %vm2868_vm5, %v3968_v44  ;;  %v5742_v45 = vpop.f32.mrb[77].mxu1 }
 0x75b   : > { %v3971_v46 = vpop.f32.mrb[78].mxu1 }
 0x75c   : > { %v5743_v47 = vpop.f32.mrb[79].mxu1 }
 0x761   : > { %v4138_v49 = vld [vmem:[#allocation5 + $0x78] sm:$0xff] }
 0x762   : > { %v4148_v50 = vpack.c.bf16 %v4138_v49, %v4137_v48 }
 0x764   : > { %4180 = vmatpush1.bf16.msra.mxu0 %v4148_v50 }
 0x765   : > { %4181 = vmatprep.subr.bf16.mxu0 %v6139_v36 }
 0x769   : > { %v4115_v51 = vpop.f32.mrb[80].mxu1 }
 0x76a   : > { %4121 = vst.msk [vmem:[#allocation5 + $0x88] sm:$0xff] %vm2868_vm5, %v4115_v51  ;;  %v5766_v52 = vpop.f32.mrb[81].mxu1 }
 0x76b   : > { %v4118_v53 = vpop.f32.mrb[82].mxu1 }
 0x76c   : > { %v5767_v54 = vpop.f32.mrb[83].mxu1 }
 0x771   : > { %v4140_v56 = vld [vmem:[#allocation5 + $0x88] sm:$0xff] }
 0x772   : > { %v4149_v57 = vpack.c.bf16 %v4140_v56, %v4139_v55 }
 0x774   : > { %4182 = vmatpush1.bf16.msra.mxu0 %v4149_v57 }
 0x777   : > { %4198 = vmatmul.mubr.bf16.vlgmr.msra.gmra.mrb[68].mxu0 %v5072_v58 }
 0x84a   : > { %v4199_v60 = vpop.f32.mrb[68].mxu0 }
 0x84b   : > { %v4200_v61 = vadd.f32 %v4199_v60, %v4154_v59  ;;  %v4201_v62 = vpop.f32.mrb[69].mxu0 }
 0x84c   : > { %v4202_v36 = vpop.f32.mrb[70].mxu0 }
 0x84d   : > { %v4205_v0 = vmax.f32 %v4200_v61, 0.0  ;;  %v4203_v8 = vpop.f32.mrb[71].mxu0 }
 0x84f   : > { %v4206_v1 = vpack.c.bf16 %v4205_v0, %v4205_v0 }
 0x851   : > { %v4231_v2 = vsel %vm2030_vm2, %v4206_v1, 0 }
 0x852   : > { %5769 = vmatpush3.bf16.msra.mxu1 %v4231_v2 }
 0x855   : > { %5771 = vmatmul.mubr.msk.bf16.vlgmr.msra.gmra.mrb[84].mxu1 %vm4226_vm6, %v6072_v3 }
 0x928   : > { %v4267_v4 = vpop.f32.mrb[84].mxu1 }
 0x929   : > { %v4268_v5 = vadd.f32 %v4267_v4, %v4214_v63  ;;  %v5772_v6 = vpop.f32.mrb[85].mxu1 }
 0x92a   : > { %v4270_v9 = vpop.f32.mrb[86].mxu1 }
 0x92b   : > { %v4274_v10 = vmax.f32 %v4268_v5, 0.0  ;;  %v4271_v11 = vadd.f32 %v4270_v9, %v4219_v7  ;;  %v5773_v12 = vpop.f32.mrb[87].mxu1 }
 0x92d   : > { %4276 = vst.msk [vmem:[%s460_s15] sm:$0xff] %vm2868_vm5, %v4274_v10  ;;  %v4275_v33 = vmax.f32 %v4271_v11, 0.0 }
 0x92f   : > { %4277 = vst.msk [vmem:[%s460_s15 + $0x8] sm:$0xff] %vm2868_vm5, %v4275_v33 }
 0x930   : > { %6086 = shalt.err (!%p6083_p3)
}
 0x931   : > { %s6087_s24 = scalar_lea.hbm %s7360_s26, 256  ;;  %s6091_s20 = scalar_lea.hbm %s7419_s14, 512 }
 0x932   : > { %p6088_p4 = scmp.ne.s32.totalorder %s7360_s26, %s6087_s24  ;;  %p6092_p9 = scmp.lt.u32.totalorder %s7360_s26, %s7419_s14 }
 0x933   : > { %p6093_p10 = scmp.lt.u32.totalorder %s6091_s20, %s6087_s24  ;;  %p6095_p12 = scmp.lt.u32.totalorder %s6087_s24, %s7360_s26 }
 0x934   : > { %p6089_p7 = pnand %p6088_p4, %p6256_p5 }
 0x935   : > { %p6094_p11 = por %p6093_p10, %p6092_p9 }
 0x936   : > { %p6090_p8 = pneg %p6089_p7 }
 0x937   : > { %p6096_p13 = por %p6095_p12, %p6094_p11 }
 0x939   : > { %p6097_p0 = pnand %p6096_p13, %p6090_p8 }
 0x93b   : > { %6100 = shalt.err (!%p6097_p0)
}
 0x93c   : > { %s6141_s27 = smov 128   ;;  %s6142_s28 = smov 8  }
 0x93d   : > { %5774 = dma.vmem_to_hbm [thread:$0]  (%p6256_p5), %s7355_s29, 256, %s7360_s26, %s7364_s17, %s6141_s27, %s6141_s27, %s6142_s28  }
 0x93e PF: > { %s7432_s22 = sld [smem:[#allocation9_spill]]  ;;  %p5780_p1 = scmp.ge.s32.totalorder %s6135_s16, 2 }
 0x940   : > { %p5777_p2 = pnand %p5780_p1, %p6260_p6 }
 0x944   : > { %s4307_s21 = sand.u32 1, %s7432_s22  }
 0x945   : > { %s4308_s24 = scalar_lea.sflag [#allocation7], %s4307_s21 }
 0x946   : > { %6118 = dma.done.wait (!%p5777_p2), %s4308_s24, 256  }
 0x947   : > { %6120 = vsyncadd (!%p5777_p2), %s4308_s24, 4294967040  ;;  %s7434_s16 = sld [smem:[#allocation11_spill]]  ;;  %s7435_s15 = sld [smem:[#allocation10_spill]] }
 0x948   : > { %s7436_s20 = sld [smem:[#allocation12_spill]]  ;;  %s7437_s29 = smov %s6127_s30 }
 0x94d   : > { %p24_p3 = scmp.ge.s32.totalorder %s7434_s16, 4   ;;  %s7438_s30 = smov %s7435_s15 }
 0x94e   : > { %s7439_s15 = smov %s7436_s20 }
 0x94f   :  { %26 = sbr.rel (!%p24_p3) target bundleno = 3 (0x3), region = 130 }
 0x956   :  { %4313 = vsyncpa [#allocation7], 1 }
 0x957   :  { %4315 = vsyncpa [#allocation7 + $0x1], 1 }

</bundles_post_ra>
